<compile_context>
chip_gen: v7x
topology: tpu7x:2x2x1
jax: 0.10.0
libtpu: 0.0.40
codegen_flags: <defaults>
</compile_context>

<pallas_src>
import functools
import math

import jax
import jax.numpy as jnp
from jax.experimental import pallas as pl
from jax.experimental.pallas import tpu as pltpu


def _round_up(x, m):
    return (x + m - 1) // m * m


# ----------------------------------------------------------------------------
# Fused conv + BN + dropout + (fused 1x1 shortcut | identity residual) + ReLU
# ----------------------------------------------------------------------------
def _fused_conv_kernel(*refs, taps, oh, ow, relu_pre, relu_post, dropout_p,
                       has_mask, has_identity, has_shortcut):
    """One (batch image, Cout tile) grid step.

    Implicit im2col: the activation block is the stride-phase-decomposed,
    zero-padded image; every conv tap is a contiguous (oh, ow) window of it.
    The tap loop is unrolled at trace time and accumulated in f32 on the MXU.
    """
    idx = 0
    x_ref = refs[idx]; idx += 1                  # (1, PHq, Wqp, Cp) bf16
    w_ref = refs[idx]; idx += 1                  # (kh*kw, Cp, tn)   bf16
    b_ref = refs[idx]; idx += 1                  # (1, tn)           f32
    mask_ref = res_ref = None
    sx_ref = sw_ref = sb_ref = None
    if has_mask:
        mask_ref = refs[idx]; idx += 1           # (1, M, tn) bf16 {0,1}
    if has_identity:
        res_ref = refs[idx]; idx += 1            # (1, M, tn) bf16 residual
    if has_shortcut:
        sx_ref, sw_ref, sb_ref = refs[idx:idx + 3]; idx += 3
    o_ref = refs[idx]

    m = oh * ow
    tn = w_ref.shape[-1]
    x_img = x_ref[0]                             # (PHq, Wqp, Cp) bf16 image

    acc = jnp.zeros((m, tn), jnp.float32)
    for t, (ri, cj) in enumerate(taps):          # unrolled: kh*kw MXU calls
        win = x_img[ri:ri + oh, cj:cj + ow, :]   # (oh, ow, Cp) static window
        acc = acc + jnp.dot(win.reshape(m, win.shape[-1]), w_ref[t],
                            preferred_element_type=jnp.float32)

    acc = acc + b_ref[...]                       # folded-BN bias (scale in W)
    if relu_pre:                                 # conv1: ReLU before dropout
        acc = jnp.maximum(acc, 0.0)
    if has_mask:                                 # F.dropout(p, training=True)
        scale = jnp.float32(1.0 / (1.0 - dropout_p))
        acc = acc * (mask_ref[0].astype(jnp.float32) * scale)
    if has_shortcut:                             # fused 1x1 shortcut conv + BN
        acc = acc + jnp.dot(sx_ref[0], sw_ref[...],
                            preferred_element_type=jnp.float32) + sb_ref[...]
    if has_identity:                             # identity residual (bf16)
        acc = acc + res_ref[0].astype(jnp.float32)
    if relu_post:                                # conv2: ReLU after residual
        acc = jnp.maximum(acc, 0.0)
    o_ref[0] = acc.astype(o_ref.dtype)


# ----------------------------------------------------------------------------
# Wrapper: implicit-im2col conv via stride-phase decomposition
# ----------------------------------------------------------------------------
def conv_bn_fused(x, cfg, arr, *, relu_pre=False, relu_post=False,
                  dropout_p=0.0, rng=None, identity=None, shortcut=None,
                  out_dtype=jnp.float32, return_padded=False):
    """x: (N, H, W, Cp) NHWC bf16, channel-padded to cfg['cin_p'].

    identity: optional (N, M, cout_p) bf16 residual added before relu_post.
    shortcut: optional dict(x=(N, M, cxp) bf16, w=(cxp, cout_p) bf16,
              b=(1, cout_p) f32) -> fused 1x1 shortcut conv residual.
    Returns (N, OH, OW, Cout) or the channel-padded (N, OH, OW, cout_p) when
    return_padded=True (no slice + re-pad round trip between chained convs).
    """
    x = x.astype(jnp.bfloat16)
    N, H, W, Cp = x.shape
    kh, kw, s, pad = cfg["kh"], cfg["kw"], cfg["stride"], cfg["padding"]
    Cout, Cop = cfg["cout"], cfg["cout_p"]
    assert Cp == cfg["cin_p"]
    assert not (identity is not None and shortcut is not None)
    OH = (H + 2 * pad - kh) // s + 1
    OW = (W + 2 * pad - kw) // s + 1
    M = OH * OW
    # tn=256 matches the 256-wide MXU on v6e/v7x when Cout allows; 128 is the
    # v5e-native width and the fallback.  (Demo layers use 128.)
    tn = 256 if Cop % 256 == 0 else 128

    # Spatial zero-pad once (channels are already padded by the caller).
    xp = jnp.pad(x, ((0, 0), (pad, pad), (pad, pad), (0, 0)))
    Hp, Wp = H + 2 * pad, W + 2 * pad

    # Stride-phase decomposition: phase (a, b) = xp[:, a::s, b::s, :].  Every
    # conv tap (ki, kj) is then a *contiguous* (OH, OW) window of one phase, so
    # the kernel does im2col implicitly (1x activation traffic, not kh*kw x).
    # For s == 1 there is a single phase (just the padded image, no concat).
    taps_raw = [(ki, kj) for ki in range(kh) for kj in range(kw)]
    if s == 1:
        Wqp = _round_up(max(Wp, 8), 8)
        xphase = jnp.pad(xp, ((0, 0), (0, 0), (0, Wqp - Wp), (0, 0)))
        PHq = Hp
        taps = tuple(taps_raw)
    else:
        phase_keys = sorted({(ki % s, kj % s) for ki, kj in taps_raw})
        pidx = {k: i for i, k in enumerate(phase_keys)}
        Hq, Wq = -(-Hp // s), -(-Wp // s)
        Wqp = _round_up(max(Wq, 8), 8)
        phs = []
        for (a, b) in phase_keys:
            ph = xp[:, a::s, b::s, :]
            ph = jnp.pad(ph, ((0, 0), (0, Hq - ph.shape[1]),
                              (0, Wqp - ph.shape[2]), (0, 0)))
            phs.append(ph)
        xphase = phs[0] if len(phs) == 1 else jnp.concatenate(phs, axis=1)
        PHq = Hq * len(phase_keys)
        taps = tuple((pidx[(ki % s, kj % s)] * Hq + ki // s, kj // s)
                     for ki, kj in taps_raw)

    ins = [xphase, arr["w_k"], arr["b_k"]]
    in_specs = [
        pl.BlockSpec((1, PHq, Wqp, Cp), lambda n, j: (n, 0, 0, 0)),
        pl.BlockSpec((kh * kw, Cp, tn), lambda n, j: (0, 0, j)),
        pl.BlockSpec((1, tn), lambda n, j: (0, j)),
    ]
    has_mask = dropout_p > 0.0
    if has_mask:
        keep = jax.random.bernoulli(rng, 1.0 - dropout_p, (N, M, Cop))
        ins.append(keep.astype(jnp.bfloat16))      # {0,1} bf16; scaled in-kernel
        in_specs.append(pl.BlockSpec((1, M, tn), lambda n, j: (n, 0, j)))
    has_identity = identity is not None
    if has_identity:
        ins.append(identity.astype(jnp.bfloat16))  # bf16 residual (f32 add in-kernel)
        in_specs.append(pl.BlockSpec((1, M, tn), lambda n, j: (n, 0, j)))
    has_shortcut = shortcut is not None
    if has_shortcut:
        cxp = shortcut["x"].shape[-1]
        ins += [shortcut["x"].astype(jnp.bfloat16), shortcut["w"], shortcut["b"]]
        in_specs += [
            pl.BlockSpec((1, M, cxp), lambda n, j: (n, 0, 0)),
            pl.BlockSpec((cxp, tn), lambda n, j: (0, j)),
            pl.BlockSpec((1, tn), lambda n, j: (0, j)),
        ]

    out = pl.pallas_call(
        functools.partial(_fused_conv_kernel, taps=taps, oh=OH, ow=OW,
                          relu_pre=relu_pre, relu_post=relu_post,
                          dropout_p=float(dropout_p), has_mask=has_mask,
                          has_identity=has_identity, has_shortcut=has_shortcut),
        out_shape=jax.ShapeDtypeStruct((N, M, Cop), out_dtype),
        grid=(N, Cop // tn),
        in_specs=in_specs,
        out_specs=pl.BlockSpec((1, M, tn), lambda n, j: (n, 0, j)),
        compiler_params=pltpu.CompilerParams(
            dimension_semantics=("parallel", "parallel"),
            vmem_limit_bytes=32 * 1024 * 1024),   # explicit; tiny tiles, safe on v7x
    )(*ins)
    if return_padded:
        return out.reshape(N, OH, OW, Cop)
    return out[:, :, :Cout].reshape(N, OH, OW, Cout)


# ----------------------------------------------------------------------------
# Deterministic parameter init (conv + folded eval-mode BN), prepped ONCE
# ----------------------------------------------------------------------------
def _bn_init(key, c, eps=1e-5):
    kg, kb, km, kv = jax.random.split(key, 4)
    gamma = 1.0 + 0.1 * jax.random.normal(kg, (c,), jnp.float32)
    beta = 0.1 * jax.random.normal(kb, (c,), jnp.float32)
    mean = 0.1 * jax.random.normal(km, (c,), jnp.float32)
    var = 1.0 + 0.1 * jax.random.uniform(kv, (c,), jnp.float32)
    scale = gamma / jnp.sqrt(var + eps)          # folded eval-mode BN
    bias = beta - mean * scale
    return scale, bias


def _prep_conv(key, kh, kw, cin, cout, stride, padding):
    """Kaiming conv weight + folded BN; padded / bf16-cast once (not per call)."""
    kconv, kbn = jax.random.split(key)
    std = math.sqrt(2.0 / (kh * kw * cin))
    w = std * jax.random.normal(kconv, (kh, kw, cin, cout), jnp.float32)
    scale, bias = _bn_init(kbn, cout)
    w_fold = w * scale[None, None, None, :]      # BN scale folded into weights
    cin_p, cout_p = _round_up(cin, 128), _round_up(cout, 128)
    w_k = jnp.zeros((kh, kw, cin_p, cout_p), jnp.float32)
    w_k = w_k.at[:, :, :cin, :cout].set(w_fold)
    w_k = w_k.reshape(kh * kw, cin_p, cout_p).astype(jnp.bfloat16)
    b_k = jnp.zeros((1, cout_p), jnp.float32).at[0, :cout].set(bias)
    cfg = dict(kh=kh, kw=kw, stride=stride, padding=padding,
               cin=cin, cout=cout, cin_p=cin_p, cout_p=cout_p)
    arr = dict(w_fold=w_fold, bias=bias, w_k=w_k, b_k=b_k)
    return cfg, arr


def init_basic_block2(key, in_planes, planes, stride):
    k1, k2, k3 = jax.random.split(key, 3)
    cfgs, arrs = {}, {}
    cfgs["conv1"], arrs["conv1"] = _prep_conv(k1, 3, 3, in_planes, planes,
                                              stride, 1)
    cfgs["conv2"], arrs["conv2"] = _prep_conv(k2, 3, 3, planes, planes, 1, 1)
    if stride != 1 or in_planes != planes:
        cfgs["shortcut"], arrs["shortcut"] = _prep_conv(k3, 1, 1, in_planes,
                                                        planes, stride, 0)
    return cfgs, arrs


# ----------------------------------------------------------------------------
# BasicBlock2 forward (matches the PyTorch module, NCHW in / NCHW out)
# ----------------------------------------------------------------------------
def basic_block2_forward(cfgs, arrs, x_nchw, rng_key, *, dropout_p=0.3):
    """out = dropout(relu(bn1(conv1(x)))); out = dropout(bn2(conv2(out)))
       out += shortcut(x); out = relu(out)

    NCHW<->NHWC transposes sit at the module boundary only; a full network
    would keep NHWC end-to-end and drop them."""
    cfg1, cfg2 = cfgs["conv1"], cfgs["conv2"]
    x = jnp.transpose(x_nchw, (0, 2, 3, 1))                    # NCHW -> NHWC
    N, H, W, Cin = x.shape
    # Channel-pad + bf16 cast ONCE; shared by conv1 and the fused shortcut.
    xp_c = jnp.pad(x.astype(jnp.bfloat16),
                   ((0, 0), (0, 0), (0, 0), (0, cfg1["cin_p"] - Cin)))

    if dropout_p > 0.0:
        k1, k2 = jax.random.split(rng_key)
    else:
        k1 = k2 = None

    # conv1 + bn1 + relu + dropout; output stays channel-padded bf16 so it
    # feeds conv2 directly (no slice-to-Cout + re-pad HBM round trip).
    out1 = conv_bn_fused(xp_c, cfg1, arrs["conv1"], relu_pre=True,
                         dropout_p=dropout_p, rng=k1,
                         out_dtype=jnp.bfloat16, return_padded=True)

    identity = shortcut = None
    if "shortcut" in cfgs:
        # 1x1 stride-s shortcut conv is fused into the conv2 kernel: pass its
        # strided bf16 input taps + folded weight/bias, no separate kernel.
        cfg_s, arr_s = cfgs["shortcut"], arrs["shortcut"]
        s = cfg_s["stride"]
        sx = xp_c[:, ::s, ::s, :]
        OHs, OWs = sx.shape[1], sx.shape[2]
        shortcut = dict(x=sx.reshape(N, OHs * OWs, cfg_s["cin_p"]),
                        w=arr_s["w_k"].reshape(cfg_s["cin_p"], cfg_s["cout_p"]),
                        b=arr_s["b_k"])
    else:
        identity = xp_c.reshape(N, H * W, cfg1["cin_p"])       # bf16 residual

    out = conv_bn_fused(out1, cfg2, arrs["conv2"], relu_post=True,
                        dropout_p=dropout_p, rng=k2,
                        identity=identity, shortcut=shortcut,
                        out_dtype=jnp.float32)
    return jnp.transpose(out, (0, 3, 1, 2))                    # NHWC -> NCHW


def basic_block2_reference(cfgs, arrs, x_nchw):
    """Pure-XLA reference (dropout disabled), bf16 operands / f32 accumulation
    to mirror the kernel's precision."""
    def conv(x, cfg, arr):
        y = jax.lax.conv_general_dilated(
            x.astype(jnp.bfloat16), arr["w_fold"].astype(jnp.bfloat16),
            window_strides=(cfg["stride"], cfg["stride"]),
            padding=[(cfg["padding"], cfg["padding"])] * 2,
            dimension_numbers=("NHWC", "HWIO", "NHWC"),
            preferred_element_type=jnp.float32)
        return y + arr["bias"][None, None, None, :]

    x = jnp.transpose(x_nchw, (0, 2, 3, 1)).astype(jnp.float32)
    out = jnp.maximum(conv(x, cfgs["conv1"], arrs["conv1"]), 0.0)
    if "shortcut" in cfgs:
        identity = conv(x, cfgs["shortcut"], arrs["shortcut"])
    else:
        identity = x
    out = jnp.maximum(conv(out, cfgs["conv2"], arrs["conv2"]) + identity, 0.0)
    return jnp.transpose(out, (0, 3, 1, 2))


if __name__ == "__main__":
    key = jax.random.PRNGKey(0)
    kp, kx, kd = jax.random.split(key, 3)

    # Downsampling block (stride 2) — exercises the fused 1x1 shortcut path.
    in_planes, planes, stride = 16, 32, 2
    cfgs, arrs = init_basic_block2(kp, in_planes, planes, stride)
    x = jax.random.normal(kx, (2, in_planes, 16, 16), jnp.float32)   # NCHW

    # Real module semantics: F.dropout(p=0.3, training=True) active.
    fwd = jax.jit(functools.partial(basic_block2_forward, cfgs, dropout_p=0.3))
    out = fwd(arrs, x, kd)
    jax.block_until_ready(out)
    assert out.shape == (2, planes, 8, 8)
    assert bool(jnp.all(jnp.isfinite(out))) and bool(jnp.all(out >= 0.0))

    # Correctness guard: dropout disabled, compare against a pure-XLA reference.
    fwd_det = jax.jit(functools.partial(basic_block2_forward, cfgs,
                                        dropout_p=0.0))
    out_det = fwd_det(arrs, x, kd)
    ref = jax.jit(functools.partial(basic_block2_reference, cfgs))(arrs, x)
    jax.block_until_ready((out_det, ref))
    err = float(jnp.max(jnp.abs(out_det - ref)))
    assert err < 5e-2, f"shortcut block mismatch vs XLA reference: {err}"

    # Identity block (stride 1, in_planes == planes) — exercises the bf16
    # identity-residual path.
    cfgs2, arrs2 = init_basic_block2(jax.random.PRNGKey(7), 32, 32, 1)
    x2 = jax.random.normal(jax.random.PRNGKey(8), (2, 32, 8, 8), jnp.float32)
    out2 = jax.jit(functools.partial(basic_block2_forward, cfgs2,
                                     dropout_p=0.0))(arrs2, x2, kd)
    ref2 = jax.jit(functools.partial(basic_block2_reference, cfgs2))(arrs2, x2)
    jax.block_until_ready((out2, ref2))
    err2 = float(jnp.max(jnp.abs(out2 - ref2)))
    assert err2 < 5e-2, f"identity block mismatch vs XLA reference: {err2}"

    print("KERNEL_OK")
</pallas_src>

<mosaic_0001>
module attributes {stable_mosaic.version = 11 : i64} {
  func.func @_fused_conv_kernel(%arg0: i32, %arg1: i32, %arg2: memref<1x36x16x128xbf16, #tpu.memory_space<vmem>>, %arg3: memref<9x128x128xbf16, #tpu.memory_space<vmem>>, %arg4: memref<1x128xf32, #tpu.memory_space<vmem>>, %arg5: memref<1x64x128xbf16, #tpu.memory_space<vmem>>, %arg6: memref<1x64x128xbf16, #tpu.memory_space<vmem>>) attributes {dimension_semantics = [#tpu.dimension_semantics<parallel>, #tpu.dimension_semantics<parallel>], iteration_bounds = array<i64: 2, 1>, scalar_prefetch = 0 : i64, scratch_operands = 0 : i64, tpu.core_type = #tpu.core_type<tc>, window_params = [{transform_indices = @transform_0, window_bounds = array<i64: 1, 36, 16, 128>}, {transform_indices = @transform_1, window_bounds = array<i64: 9, 128, 128>}, {transform_indices = @transform_2, window_bounds = array<i64: 1, 128>}, {transform_indices = @transform_3, window_bounds = array<i64: 1, 64, 128>}, {transform_indices = @transform_4, window_bounds = array<i64: 1, 64, 128>}]} {
    %c0 = arith.constant 0 : index
    %c0_0 = arith.constant 0 : index
    %c0_1 = arith.constant 0 : index
    %c0_2 = arith.constant 0 : index
    %0 = vector.load %arg2[%c0, %c0_0, %c0_1, %c0_2] : memref<1x36x16x128xbf16, #tpu.memory_space<vmem>>, vector<1x36x16x128xbf16>
    %1 = vector.shape_cast %0 : vector<1x36x16x128xbf16> to vector<36x16x128xbf16>
    %cst = arith.constant 0.000000e+00 : f32
    %2 = vector.broadcast %cst : f32 to vector<64x128xf32>
    %3 = vector.extract_strided_slice %1 {offsets = [0, 0, 0], sizes = [8, 8, 128], strides = [1, 1, 1]} : vector<36x16x128xbf16> to vector<8x8x128xbf16>
    %4 = vector.shape_cast %3 : vector<8x8x128xbf16> to vector<64x128xbf16>
    %c0_3 = arith.constant 0 : index
    %c0_4 = arith.constant 0 : index
    %c0_5 = arith.constant 0 : index
    %5 = vector.load %arg3[%c0_3, %c0_4, %c0_5] : memref<9x128x128xbf16, #tpu.memory_space<vmem>>, vector<1x128x128xbf16>
    %6 = vector.shape_cast %5 : vector<1x128x128xbf16> to vector<128x128xbf16>
    %cst_6 = arith.constant dense<0.000000e+00> : vector<64x128xf32>
    %7 = tpu.matmul %4, %6, %cst_6 {dimension_numbers = #tpu.dot_dimension_numbers<[1], [0], [0], [1], [0, 0, 1, 1], [], []>} : vector<64x128xbf16>, vector<128x128xbf16>, vector<64x128xf32> -> vector<64x128xf32>
    %8 = arith.addf %2, %7 : vector<64x128xf32>
    %9 = vector.extract_strided_slice %1 {offsets = [9, 0, 0], sizes = [8, 8, 128], strides = [1, 1, 1]} : vector<36x16x128xbf16> to vector<8x8x128xbf16>
    %10 = vector.shape_cast %9 : vector<8x8x128xbf16> to vector<64x128xbf16>
    %c1 = arith.constant 1 : index
    %c0_7 = arith.constant 0 : index
    %c0_8 = arith.constant 0 : index
    %11 = vector.load %arg3[%c1, %c0_7, %c0_8] : memref<9x128x128xbf16, #tpu.memory_space<vmem>>, vector<1x128x128xbf16>
    %12 = vector.shape_cast %11 : vector<1x128x128xbf16> to vector<128x128xbf16>
    %cst_9 = arith.constant dense<0.000000e+00> : vector<64x128xf32>
    %13 = tpu.matmul %10, %12, %cst_9 {dimension_numbers = #tpu.dot_dimension_numbers<[1], [0], [0], [1], [0, 0, 1, 1], [], []>} : vector<64x128xbf16>, vector<128x128xbf16>, vector<64x128xf32> -> vector<64x128xf32>
    %14 = arith.addf %8, %13 : vector<64x128xf32>
    %15 = vector.extract_strided_slice %1 {offsets = [0, 1, 0], sizes = [8, 8, 128], strides = [1, 1, 1]} : vector<36x16x128xbf16> to vector<8x8x128xbf16>
    %16 = vector.shape_cast %15 : vector<8x8x128xbf16> to vector<64x128xbf16>
    %c2 = arith.constant 2 : index
    %c0_10 = arith.constant 0 : index
    %c0_11 = arith.constant 0 : index
    %17 = vector.load %arg3[%c2, %c0_10, %c0_11] : memref<9x128x128xbf16, #tpu.memory_space<vmem>>, vector<1x128x128xbf16>
    %18 = vector.shape_cast %17 : vector<1x128x128xbf16> to vector<128x128xbf16>
    %cst_12 = arith.constant dense<0.000000e+00> : vector<64x128xf32>
    %19 = tpu.matmul %16, %18, %cst_12 {dimension_numbers = #tpu.dot_dimension_numbers<[1], [0], [0], [1], [0, 0, 1, 1], [], []>} : vector<64x128xbf16>, vector<128x128xbf16>, vector<64x128xf32> -> vector<64x128xf32>
    %20 = arith.addf %14, %19 : vector<64x128xf32>
    %21 = vector.extract_strided_slice %1 {offsets = [18, 0, 0], sizes = [8, 8, 128], strides = [1, 1, 1]} : vector<36x16x128xbf16> to vector<8x8x128xbf16>
    %22 = vector.shape_cast %21 : vector<8x8x128xbf16> to vector<64x128xbf16>
    %c3 = arith.constant 3 : index
    %c0_13 = arith.constant 0 : index
    %c0_14 = arith.constant 0 : index
    %23 = vector.load %arg3[%c3, %c0_13, %c0_14] : memref<9x128x128xbf16, #tpu.memory_space<vmem>>, vector<1x128x128xbf16>
    %24 = vector.shape_cast %23 : vector<1x128x128xbf16> to vector<128x128xbf16>
    %cst_15 = arith.constant dense<0.000000e+00> : vector<64x128xf32>
    %25 = tpu.matmul %22, %24, %cst_15 {dimension_numbers = #tpu.dot_dimension_numbers<[1], [0], [0], [1], [0, 0, 1, 1], [], []>} : vector<64x128xbf16>, vector<128x128xbf16>, vector<64x128xf32> -> vector<64x128xf32>
    %26 = arith.addf %20, %25 : vector<64x128xf32>
    %27 = vector.extract_strided_slice %1 {offsets = [27, 0, 0], sizes = [8, 8, 128], strides = [1, 1, 1]} : vector<36x16x128xbf16> to vector<8x8x128xbf16>
    %28 = vector.shape_cast %27 : vector<8x8x128xbf16> to vector<64x128xbf16>
    %c4 = arith.constant 4 : index
    %c0_16 = arith.constant 0 : index
    %c0_17 = arith.constant 0 : index
    %29 = vector.load %arg3[%c4, %c0_16, %c0_17] : memref<9x128x128xbf16, #tpu.memory_space<vmem>>, vector<1x128x128xbf16>
    %30 = vector.shape_cast %29 : vector<1x128x128xbf16> to vector<128x128xbf16>
    %cst_18 = arith.constant dense<0.000000e+00> : vector<64x128xf32>
    %31 = tpu.matmul %28, %30, %cst_18 {dimension_numbers = #tpu.dot_dimension_numbers<[1], [0], [0], [1], [0, 0, 1, 1], [], []>} : vector<64x128xbf16>, vector<128x128xbf16>, vector<64x128xf32> -> vector<64x128xf32>
    %32 = arith.addf %26, %31 : vector<64x128xf32>
    %33 = vector.extract_strided_slice %1 {offsets = [18, 1, 0], sizes = [8, 8, 128], strides = [1, 1, 1]} : vector<36x16x128xbf16> to vector<8x8x128xbf16>
    %34 = vector.shape_cast %33 : vector<8x8x128xbf16> to vector<64x128xbf16>
    %c5 = arith.constant 5 : index
    %c0_19 = arith.constant 0 : index
    %c0_20 = arith.constant 0 : index
    %35 = vector.load %arg3[%c5, %c0_19, %c0_20] : memref<9x128x128xbf16, #tpu.memory_space<vmem>>, vector<1x128x128xbf16>
    %36 = vector.shape_cast %35 : vector<1x128x128xbf16> to vector<128x128xbf16>
    %cst_21 = arith.constant dense<0.000000e+00> : vector<64x128xf32>
    %37 = tpu.matmul %34, %36, %cst_21 {dimension_numbers = #tpu.dot_dimension_numbers<[1], [0], [0], [1], [0, 0, 1, 1], [], []>} : vector<64x128xbf16>, vector<128x128xbf16>, vector<64x128xf32> -> vector<64x128xf32>
    %38 = arith.addf %32, %37 : vector<64x128xf32>
    %39 = vector.extract_strided_slice %1 {offsets = [1, 0, 0], sizes = [8, 8, 128], strides = [1, 1, 1]} : vector<36x16x128xbf16> to vector<8x8x128xbf16>
    %40 = vector.shape_cast %39 : vector<8x8x128xbf16> to vector<64x128xbf16>
    %c6 = arith.constant 6 : index
    %c0_22 = arith.constant 0 : index
    %c0_23 = arith.constant 0 : index
    %41 = vector.load %arg3[%c6, %c0_22, %c0_23] : memref<9x128x128xbf16, #tpu.memory_space<vmem>>, vector<1x128x128xbf16>
    %42 = vector.shape_cast %41 : vector<1x128x128xbf16> to vector<128x128xbf16>
    %cst_24 = arith.constant dense<0.000000e+00> : vector<64x128xf32>
    %43 = tpu.matmul %40, %42, %cst_24 {dimension_numbers = #tpu.dot_dimension_numbers<[1], [0], [0], [1], [0, 0, 1, 1], [], []>} : vector<64x128xbf16>, vector<128x128xbf16>, vector<64x128xf32> -> vector<64x128xf32>
    %44 = arith.addf %38, %43 : vector<64x128xf32>
    %45 = vector.extract_strided_slice %1 {offsets = [10, 0, 0], sizes = [8, 8, 128], strides = [1, 1, 1]} : vector<36x16x128xbf16> to vector<8x8x128xbf16>
    %46 = vector.shape_cast %45 : vector<8x8x128xbf16> to vector<64x128xbf16>
    %c7 = arith.constant 7 : index
    %c0_25 = arith.constant 0 : index
    %c0_26 = arith.constant 0 : index
    %47 = vector.load %arg3[%c7, %c0_25, %c0_26] : memref<9x128x128xbf16, #tpu.memory_space<vmem>>, vector<1x128x128xbf16>
    %48 = vector.shape_cast %47 : vector<1x128x128xbf16> to vector<128x128xbf16>
    %cst_27 = arith.constant dense<0.000000e+00> : vector<64x128xf32>
    %49 = tpu.matmul %46, %48, %cst_27 {dimension_numbers = #tpu.dot_dimension_numbers<[1], [0], [0], [1], [0, 0, 1, 1], [], []>} : vector<64x128xbf16>, vector<128x128xbf16>, vector<64x128xf32> -> vector<64x128xf32>
    %50 = arith.addf %44, %49 : vector<64x128xf32>
    %51 = vector.extract_strided_slice %1 {offsets = [1, 1, 0], sizes = [8, 8, 128], strides = [1, 1, 1]} : vector<36x16x128xbf16> to vector<8x8x128xbf16>
    %52 = vector.shape_cast %51 : vector<8x8x128xbf16> to vector<64x128xbf16>
    %c8 = arith.constant 8 : index
    %c0_28 = arith.constant 0 : index
    %c0_29 = arith.constant 0 : index
    %53 = vector.load %arg3[%c8, %c0_28, %c0_29] : memref<9x128x128xbf16, #tpu.memory_space<vmem>>, vector<1x128x128xbf16>
    %54 = vector.shape_cast %53 : vector<1x128x128xbf16> to vector<128x128xbf16>
    %cst_30 = arith.constant dense<0.000000e+00> : vector<64x128xf32>
    %55 = tpu.matmul %52, %54, %cst_30 {dimension_numbers = #tpu.dot_dimension_numbers<[1], [0], [0], [1], [0, 0, 1, 1], [], []>} : vector<64x128xbf16>, vector<128x128xbf16>, vector<64x128xf32> -> vector<64x128xf32>
    %56 = arith.addf %50, %55 : vector<64x128xf32>
    %c0_31 = arith.constant 0 : index
    %c0_32 = arith.constant 0 : index
    %57 = vector.load %arg4[%c0_31, %c0_32] : memref<1x128xf32, #tpu.memory_space<vmem>>, vector<1x128xf32>
    %58 = vector.broadcast %57 : vector<1x128xf32> to vector<64x128xf32>
    %59 = arith.addf %56, %58 : vector<64x128xf32>
    %cst_33 = arith.constant 0.000000e+00 : f32
    %60 = vector.broadcast %cst_33 : f32 to vector<64x128xf32>
    %61 = arith.maximumf %59, %60 : vector<64x128xf32>
    %c0_34 = arith.constant 0 : index
    %c0_35 = arith.constant 0 : index
    %c0_36 = arith.constant 0 : index
    %62 = vector.load %arg5[%c0_34, %c0_35, %c0_36] : memref<1x64x128xbf16, #tpu.memory_space<vmem>>, vector<1x64x128xbf16>
    %63 = vector.shape_cast %62 : vector<1x64x128xbf16> to vector<64x128xbf16>
    %64 = arith.extf %63 : vector<64x128xbf16> to vector<64x128xf32>
    %cst_37 = arith.constant 1.42857146 : f32
    %65 = vector.broadcast %cst_37 : f32 to vector<64x128xf32>
    %66 = arith.mulf %64, %65 : vector<64x128xf32>
    %67 = arith.mulf %61, %66 : vector<64x128xf32>
    %68 = arith.truncf %67 : vector<64x128xf32> to vector<64x128xbf16>
    %c0_38 = arith.constant 0 : index
    %c0_39 = arith.constant 0 : index
    %c0_40 = arith.constant 0 : index
    %69 = vector.load %arg6[%c0_38, %c0_39, %c0_40] : memref<1x64x128xbf16, #tpu.memory_space<vmem>>, vector<1x64x128xbf16>
    %70 = vector.shape_cast %69 : vector<1x64x128xbf16> to vector<64x128xbf16>
    %71 = vector.shape_cast %68 : vector<64x128xbf16> to vector<1x64x128xbf16>
    tpu.vector_store %arg6[%c0_38, %c0_39, %c0_40], %71 {strides = array<i32>} : memref<1x64x128xbf16, #tpu.memory_space<vmem>>, vector<1x64x128xbf16>,
    return
  }
  func.func @transform_0(%arg0: i32, %arg1: i32) -> (i32, i32, i32, i32) {
    %c0_i32 = arith.constant 0 : i32
    %c0_i32_0 = arith.constant 0 : i32
    %c0_i32_1 = arith.constant 0 : i32
    %c0_i32_2 = arith.constant 0 : i32
    return %arg0, %c0_i32, %c0_i32_0, %c0_i32_1 : i32, i32, i32, i32
  }
  func.func @transform_1(%arg0: i32, %arg1: i32) -> (i32, i32, i32) {
    %c0_i32 = arith.constant 0 : i32
    %c0_i32_0 = arith.constant 0 : i32
    %c0_i32_1 = arith.constant 0 : i32
    return %c0_i32, %c0_i32_0, %arg1 : i32, i32, i32
  }
  func.func @transform_2(%arg0: i32, %arg1: i32) -> (i32, i32) {
    %c0_i32 = arith.constant 0 : i32
    %c0_i32_0 = arith.constant 0 : i32
    return %c0_i32, %arg1 : i32, i32
  }
  func.func @transform_3(%arg0: i32, %arg1: i32) -> (i32, i32, i32) {
    %c0_i32 = arith.constant 0 : i32
    %c0_i32_0 = arith.constant 0 : i32
    return %arg0, %c0_i32, %arg1 : i32, i32, i32
  }
  func.func @transform_4(%arg0: i32, %arg1: i32) -> (i32, i32, i32) {
    %c0_i32 = arith.constant 0 : i32
    %c0_i32_0 = arith.constant 0 : i32
    return %arg0, %c0_i32, %arg1 : i32, i32, i32
  }
}

module attributes {stable_mosaic.version = 11 : i64} {
  func.func @_fused_conv_kernel(%arg0: i32, %arg1: i32, %arg2: memref<1x10x16x128xbf16, #tpu.memory_space<vmem>>, %arg3: memref<9x128x128xbf16, #tpu.memory_space<vmem>>, %arg4: memref<1x128xf32, #tpu.memory_space<vmem>>, %arg5: memref<1x64x128xbf16, #tpu.memory_space<vmem>>, %arg6: memref<1x64x128xbf16, #tpu.memory_space<vmem>>, %arg7: memref<128x128xbf16, #tpu.memory_space<vmem>>, %arg8: memref<1x128xf32, #tpu.memory_space<vmem>>, %arg9: memref<1x64x128xf32, #tpu.memory_space<vmem>>) attributes {dimension_semantics = [#tpu.dimension_semantics<parallel>, #tpu.dimension_semantics<parallel>], iteration_bounds = array<i64: 2, 1>, scalar_prefetch = 0 : i64, scratch_operands = 0 : i64, tpu.core_type = #tpu.core_type<tc>, window_params = [{transform_indices = @transform_0, window_bounds = array<i64: 1, 10, 16, 128>}, {transform_indices = @transform_1, window_bounds = array<i64: 9, 128, 128>}, {transform_indices = @transform_2, window_bounds = array<i64: 1, 128>}, {transform_indices = @transform_3, window_bounds = array<i64: 1, 64, 128>}, {transform_indices = @transform_4, window_bounds = array<i64: 1, 64, 128>}, {transform_indices = @transform_5, window_bounds = array<i64: 128, 128>}, {transform_indices = @transform_6, window_bounds = array<i64: 1, 128>}, {transform_indices = @transform_7, window_bounds = array<i64: 1, 64, 128>}]} {
    %c0 = arith.constant 0 : index
    %c0_0 = arith.constant 0 : index
    %c0_1 = arith.constant 0 : index
    %c0_2 = arith.constant 0 : index
    %0 = vector.load %arg2[%c0, %c0_0, %c0_1, %c0_2] : memref<1x10x16x128xbf16, #tpu.memory_space<vmem>>, vector<1x10x16x128xbf16>
    %1 = vector.shape_cast %0 : vector<1x10x16x128xbf16> to vector<10x16x128xbf16>
    %cst = arith.constant 0.000000e+00 : f32
    %2 = vector.broadcast %cst : f32 to vector<64x128xf32>
    %3 = vector.extract_strided_slice %1 {offsets = [0, 0, 0], sizes = [8, 8, 128], strides = [1, 1, 1]} : vector<10x16x128xbf16> to vector<8x8x128xbf16>
    %4 = vector.shape_cast %3 : vector<8x8x128xbf16> to vector<64x128xbf16>
    %c0_3 = arith.constant 0 : index
    %c0_4 = arith.constant 0 : index
    %c0_5 = arith.constant 0 : index
    %5 = vector.load %arg3[%c0_3, %c0_4, %c0_5] : memref<9x128x128xbf16, #tpu.memory_space<vmem>>, vector<1x128x128xbf16>
    %6 = vector.shape_cast %5 : vector<1x128x128xbf16> to vector<128x128xbf16>
    %cst_6 = arith.constant dense<0.000000e+00> : vector<64x128xf32>
    %7 = tpu.matmul %4, %6, %cst_6 {dimension_numbers = #tpu.dot_dimension_numbers<[1], [0], [0], [1], [0, 0, 1, 1], [], []>} : vector<64x128xbf16>, vector<128x128xbf16>, vector<64x128xf32> -> vector<64x128xf32>
    %8 = arith.addf %2, %7 : vector<64x128xf32>
    %9 = vector.extract_strided_slice %1 {offsets = [0, 1, 0], sizes = [8, 8, 128], strides = [1, 1, 1]} : vector<10x16x128xbf16> to vector<8x8x128xbf16>
    %10 = vector.shape_cast %9 : vector<8x8x128xbf16> to vector<64x128xbf16>
    %c1 = arith.constant 1 : index
    %c0_7 = arith.constant 0 : index
    %c0_8 = arith.constant 0 : index
    %11 = vector.load %arg3[%c1, %c0_7, %c0_8] : memref<9x128x128xbf16, #tpu.memory_space<vmem>>, vector<1x128x128xbf16>
    %12 = vector.shape_cast %11 : vector<1x128x128xbf16> to vector<128x128xbf16>
    %cst_9 = arith.constant dense<0.000000e+00> : vector<64x128xf32>
    %13 = tpu.matmul %10, %12, %cst_9 {dimension_numbers = #tpu.dot_dimension_numbers<[1], [0], [0], [1], [0, 0, 1, 1], [], []>} : vector<64x128xbf16>, vector<128x128xbf16>, vector<64x128xf32> -> vector<64x128xf32>
    %14 = arith.addf %8, %13 : vector<64x128xf32>
    %15 = vector.extract_strided_slice %1 {offsets = [0, 2, 0], sizes = [8, 8, 128], strides = [1, 1, 1]} : vector<10x16x128xbf16> to vector<8x8x128xbf16>
    %16 = vector.shape_cast %15 : vector<8x8x128xbf16> to vector<64x128xbf16>
    %c2 = arith.constant 2 : index
    %c0_10 = arith.constant 0 : index
    %c0_11 = arith.constant 0 : index
    %17 = vector.load %arg3[%c2, %c0_10, %c0_11] : memref<9x128x128xbf16, #tpu.memory_space<vmem>>, vector<1x128x128xbf16>
    %18 = vector.shape_cast %17 : vector<1x128x128xbf16> to vector<128x128xbf16>
    %cst_12 = arith.constant dense<0.000000e+00> : vector<64x128xf32>
    %19 = tpu.matmul %16, %18, %cst_12 {dimension_numbers = #tpu.dot_dimension_numbers<[1], [0], [0], [1], [0, 0, 1, 1], [], []>} : vector<64x128xbf16>, vector<128x128xbf16>, vector<64x128xf32> -> vector<64x128xf32>
    %20 = arith.addf %14, %19 : vector<64x128xf32>
    %21 = vector.extract_strided_slice %1 {offsets = [1, 0, 0], sizes = [8, 8, 128], strides = [1, 1, 1]} : vector<10x16x128xbf16> to vector<8x8x128xbf16>
    %22 = vector.shape_cast %21 : vector<8x8x128xbf16> to vector<64x128xbf16>
    %c3 = arith.constant 3 : index
    %c0_13 = arith.constant 0 : index
    %c0_14 = arith.constant 0 : index
    %23 = vector.load %arg3[%c3, %c0_13, %c0_14] : memref<9x128x128xbf16, #tpu.memory_space<vmem>>, vector<1x128x128xbf16>
    %24 = vector.shape_cast %23 : vector<1x128x128xbf16> to vector<128x128xbf16>
    %cst_15 = arith.constant dense<0.000000e+00> : vector<64x128xf32>
    %25 = tpu.matmul %22, %24, %cst_15 {dimension_numbers = #tpu.dot_dimension_numbers<[1], [0], [0], [1], [0, 0, 1, 1], [], []>} : vector<64x128xbf16>, vector<128x128xbf16>, vector<64x128xf32> -> vector<64x128xf32>
    %26 = arith.addf %20, %25 : vector<64x128xf32>
    %27 = vector.extract_strided_slice %1 {offsets = [1, 1, 0], sizes = [8, 8, 128], strides = [1, 1, 1]} : vector<10x16x128xbf16> to vector<8x8x128xbf16>
    %28 = vector.shape_cast %27 : vector<8x8x128xbf16> to vector<64x128xbf16>
    %c4 = arith.constant 4 : index
    %c0_16 = arith.constant 0 : index
    %c0_17 = arith.constant 0 : index
    %29 = vector.load %arg3[%c4, %c0_16, %c0_17] : memref<9x128x128xbf16, #tpu.memory_space<vmem>>, vector<1x128x128xbf16>
    %30 = vector.shape_cast %29 : vector<1x128x128xbf16> to vector<128x128xbf16>
    %cst_18 = arith.constant dense<0.000000e+00> : vector<64x128xf32>
    %31 = tpu.matmul %28, %30, %cst_18 {dimension_numbers = #tpu.dot_dimension_numbers<[1], [0], [0], [1], [0, 0, 1, 1], [], []>} : vector<64x128xbf16>, vector<128x128xbf16>, vector<64x128xf32> -> vector<64x128xf32>
    %32 = arith.addf %26, %31 : vector<64x128xf32>
    %33 = vector.extract_strided_slice %1 {offsets = [1, 2, 0], sizes = [8, 8, 128], strides = [1, 1, 1]} : vector<10x16x128xbf16> to vector<8x8x128xbf16>
    %34 = vector.shape_cast %33 : vector<8x8x128xbf16> to vector<64x128xbf16>
    %c5 = arith.constant 5 : index
    %c0_19 = arith.constant 0 : index
    %c0_20 = arith.constant 0 : index
    %35 = vector.load %arg3[%c5, %c0_19, %c0_20] : memref<9x128x128xbf16, #tpu.memory_space<vmem>>, vector<1x128x128xbf16>
    %36 = vector.shape_cast %35 : vector<1x128x128xbf16> to vector<128x128xbf16>
    %cst_21 = arith.constant dense<0.000000e+00> : vector<64x128xf32>
    %37 = tpu.matmul %34, %36, %cst_21 {dimension_numbers = #tpu.dot_dimension_numbers<[1], [0], [0], [1], [0, 0, 1, 1], [], []>} : vector<64x128xbf16>, vector<128x128xbf16>, vector<64x128xf32> -> vector<64x128xf32>
    %38 = arith.addf %32, %37 : vector<64x128xf32>
    %39 = vector.extract_strided_slice %1 {offsets = [2, 0, 0], sizes = [8, 8, 128], strides = [1, 1, 1]} : vector<10x16x128xbf16> to vector<8x8x128xbf16>
    %40 = vector.shape_cast %39 : vector<8x8x128xbf16> to vector<64x128xbf16>
    %c6 = arith.constant 6 : index
    %c0_22 = arith.constant 0 : index
    %c0_23 = arith.constant 0 : index
    %41 = vector.load %arg3[%c6, %c0_22, %c0_23] : memref<9x128x128xbf16, #tpu.memory_space<vmem>>, vector<1x128x128xbf16>
    %42 = vector.shape_cast %41 : vector<1x128x128xbf16> to vector<128x128xbf16>
    %cst_24 = arith.constant dense<0.000000e+00> : vector<64x128xf32>
    %43 = tpu.matmul %40, %42, %cst_24 {dimension_numbers = #tpu.dot_dimension_numbers<[1], [0], [0], [1], [0, 0, 1, 1], [], []>} : vector<64x128xbf16>, vector<128x128xbf16>, vector<64x128xf32> -> vector<64x128xf32>
    %44 = arith.addf %38, %43 : vector<64x128xf32>
    %45 = vector.extract_strided_slice %1 {offsets = [2, 1, 0], sizes = [8, 8, 128], strides = [1, 1, 1]} : vector<10x16x128xbf16> to vector<8x8x128xbf16>
    %46 = vector.shape_cast %45 : vector<8x8x128xbf16> to vector<64x128xbf16>
    %c7 = arith.constant 7 : index
    %c0_25 = arith.constant 0 : index
    %c0_26 = arith.constant 0 : index
    %47 = vector.load %arg3[%c7, %c0_25, %c0_26] : memref<9x128x128xbf16, #tpu.memory_space<vmem>>, vector<1x128x128xbf16>
    %48 = vector.shape_cast %47 : vector<1x128x128xbf16> to vector<128x128xbf16>
    %cst_27 = arith.constant dense<0.000000e+00> : vector<64x128xf32>
    %49 = tpu.matmul %46, %48, %cst_27 {dimension_numbers = #tpu.dot_dimension_numbers<[1], [0], [0], [1], [0, 0, 1, 1], [], []>} : vector<64x128xbf16>, vector<128x128xbf16>, vector<64x128xf32> -> vector<64x128xf32>
    %50 = arith.addf %44, %49 : vector<64x128xf32>
    %51 = vector.extract_strided_slice %1 {offsets = [2, 2, 0], sizes = [8, 8, 128], strides = [1, 1, 1]} : vector<10x16x128xbf16> to vector<8x8x128xbf16>
    %52 = vector.shape_cast %51 : vector<8x8x128xbf16> to vector<64x128xbf16>
    %c8 = arith.constant 8 : index
    %c0_28 = arith.constant 0 : index
    %c0_29 = arith.constant 0 : index
    %53 = vector.load %arg3[%c8, %c0_28, %c0_29] : memref<9x128x128xbf16, #tpu.memory_space<vmem>>, vector<1x128x128xbf16>
    %54 = vector.shape_cast %53 : vector<1x128x128xbf16> to vector<128x128xbf16>
    %cst_30 = arith.constant dense<0.000000e+00> : vector<64x128xf32>
    %55 = tpu.matmul %52, %54, %cst_30 {dimension_numbers = #tpu.dot_dimension_numbers<[1], [0], [0], [1], [0, 0, 1, 1], [], []>} : vector<64x128xbf16>, vector<128x128xbf16>, vector<64x128xf32> -> vector<64x128xf32>
    %56 = arith.addf %50, %55 : vector<64x128xf32>
    %c0_31 = arith.constant 0 : index
    %c0_32 = arith.constant 0 : index
    %57 = vector.load %arg4[%c0_31, %c0_32] : memref<1x128xf32, #tpu.memory_space<vmem>>, vector<1x128xf32>
    %58 = vector.broadcast %57 : vector<1x128xf32> to vector<64x128xf32>
    %59 = arith.addf %56, %58 : vector<64x128xf32>
    %c0_33 = arith.constant 0 : index
    %c0_34 = arith.constant 0 : index
    %c0_35 = arith.constant 0 : index
    %60 = vector.load %arg5[%c0_33, %c0_34, %c0_35] : memref<1x64x128xbf16, #tpu.memory_space<vmem>>, vector<1x64x128xbf16>
    %61 = vector.shape_cast %60 : vector<1x64x128xbf16> to vector<64x128xbf16>
    %62 = arith.extf %61 : vector<64x128xbf16> to vector<64x128xf32>
    %cst_36 = arith.constant 1.42857146 : f32
    %63 = vector.broadcast %cst_36 : f32 to vector<64x128xf32>
    %64 = arith.mulf %62, %63 : vector<64x128xf32>
    %65 = arith.mulf %59, %64 : vector<64x128xf32>
    %c0_37 = arith.constant 0 : index
    %c0_38 = arith.constant 0 : index
    %c0_39 = arith.constant 0 : index
    %66 = vector.load %arg6[%c0_37, %c0_38, %c0_39] : memref<1x64x128xbf16, #tpu.memory_space<vmem>>, vector<1x64x128xbf16>
    %67 = vector.shape_cast %66 : vector<1x64x128xbf16> to vector<64x128xbf16>
    %c0_40 = arith.constant 0 : index
    %c0_41 = arith.constant 0 : index
    %68 = vector.load %arg7[%c0_40, %c0_41] : memref<128x128xbf16, #tpu.memory_space<vmem>>, vector<128x128xbf16>
    %cst_42 = arith.constant dense<0.000000e+00> : vector<64x128xf32>
    %69 = tpu.matmul %67, %68, %cst_42 {dimension_numbers = #tpu.dot_dimension_numbers<[1], [0], [0], [1], [0, 0, 1, 1], [], []>} : vector<64x128xbf16>, vector<128x128xbf16>, vector<64x128xf32> -> vector<64x128xf32>
    %70 = arith.addf %65, %69 : vector<64x128xf32>
    %c0_43 = arith.constant 0 : index
    %c0_44 = arith.constant 0 : index
    %71 = vector.load %arg8[%c0_43, %c0_44] : memref<1x128xf32, #tpu.memory_space<vmem>>, vector<1x128xf32>
    %72 = vector.broadcast %71 : vector<1x128xf32> to vector<64x128xf32>
    %73 = arith.addf %70, %72 : vector<64x128xf32>
    %cst_45 = arith.constant 0.000000e+00 : f32
    %74 = vector.broadcast %cst_45 : f32 to vector<64x128xf32>
    %75 = arith.maximumf %73, %74 : vector<64x128xf32>
    %c0_46 = arith.constant 0 : index
    %c0_47 = arith.constant 0 : index
    %c0_48 = arith.constant 0 : index
    %76 = vector.load %arg9[%c0_46, %c0_47, %c0_48] : memref<1x64x128xf32, #tpu.memory_space<vmem>>, vector<1x64x128xf32>
    %77 = vector.shape_cast %76 : vector<1x64x128xf32> to vector<64x128xf32>
    %78 = vector.shape_cast %75 : vector<64x128xf32> to vector<1x64x128xf32>
    tpu.vector_store %arg9[%c0_46, %c0_47, %c0_48], %78 {strides = array<i32>} : memref<1x64x128xf32, #tpu.memory_space<vmem>>, vector<1x64x128xf32>,
    return
  }
  func.func @transform_0(%arg0: i32, %arg1: i32) -> (i32, i32, i32, i32) {
    %c0_i32 = arith.constant 0 : i32
    %c0_i32_0 = arith.constant 0 : i32
    %c0_i32_1 = arith.constant 0 : i32
    %c0_i32_2 = arith.constant 0 : i32
    return %arg0, %c0_i32, %c0_i32_0, %c0_i32_1 : i32, i32, i32, i32
  }
  func.func @transform_1(%arg0: i32, %arg1: i32) -> (i32, i32, i32) {
    %c0_i32 = arith.constant 0 : i32
    %c0_i32_0 = arith.constant 0 : i32
    %c0_i32_1 = arith.constant 0 : i32
    return %c0_i32, %c0_i32_0, %arg1 : i32, i32, i32
  }
  func.func @transform_2(%arg0: i32, %arg1: i32) -> (i32, i32) {
    %c0_i32 = arith.constant 0 : i32
    %c0_i32_0 = arith.constant 0 : i32
    return %c0_i32, %arg1 : i32, i32
  }
  func.func @transform_3(%arg0: i32, %arg1: i32) -> (i32, i32, i32) {
    %c0_i32 = arith.constant 0 : i32
    %c0_i32_0 = arith.constant 0 : i32
    return %arg0, %c0_i32, %arg1 : i32, i32, i32
  }
  func.func @transform_4(%arg0: i32, %arg1: i32) -> (i32, i32, i32) {
    %c0_i32 = arith.constant 0 : i32
    %c0_i32_0 = arith.constant 0 : i32
    %c0_i32_1 = arith.constant 0 : i32
    return %arg0, %c0_i32, %c0_i32_0 : i32, i32, i32
  }
  func.func @transform_5(%arg0: i32, %arg1: i32) -> (i32, i32) {
    %c0_i32 = arith.constant 0 : i32
    %c0_i32_0 = arith.constant 0 : i32
    return %c0_i32, %arg1 : i32, i32
  }
  func.func @transform_6(%arg0: i32, %arg1: i32) -> (i32, i32) {
    %c0_i32 = arith.constant 0 : i32
    %c0_i32_0 = arith.constant 0 : i32
    return %c0_i32, %arg1 : i32, i32
  }
  func.func @transform_7(%arg0: i32, %arg1: i32) -> (i32, i32, i32) {
    %c0_i32 = arith.constant 0 : i32
    %c0_i32_0 = arith.constant 0 : i32
    return %arg0, %c0_i32, %arg1 : i32, i32, i32
  }
}

</mosaic_0001>

<bundles_post_ra>
// kernel: basic_block2_forward.4
= control target key start
LH: loop header
LB: loop body
LE: loop exit
PB: predicated region body
PF: predicated region fallthrough
CT: control target
= control target key end

     0   :  { %s3058_s15 = smov 0   ;;  %s3060_s16 = smov 0   ;;  %s3594_s0 = inlined_call_operand.vmem [shape: bf16[2,36,16,128], index: 0, kind: input, shape index: {}]   ;;  %s3595_s1 = inlined_call_operand.vmem [shape: bf16[9,128,128], index: 1, kind: input, shape index: {}]   ;;  %s3596_s2 = inlined_call_operand.vmem [shape: f32[1,128], index: 2, kind: input, shape index: {}]   ;;  %s3597_s3 = inlined_call_operand.vmem [shape: bf16[2,64,128], index: 3, kind: input, shape index: {}]   ;;  %s3598_s4 = inlined_call_operand.vmem [shape: bf16[2,64,128], index: 4, kind: output, shape index: {}]  }
   0x1   :  { %s3062_s17 = smov 0  }
   0x2 LB: > { %s26_s18 = sadd.s32 1, %s3027_s16  ;;  %p2179_p0 = scmp.ge.s32.totalorder %s3031_s17, 1  ;;  %s3031_s17 = sphi %s3062_s17, %s14_s17   ;;  %s3027_s16 = sphi %s3060_s16, %s3602_s16   ;;  %s3023_s15 = sphi %s3058_s15, %s3601_s15  }
   0x3   : > { %p28_p1 = scmp.ge.s32.totalorder %s26_s18, 2  ;;  %p208_p2 = scmp.lt.s32.totalorder %s3031_s17, 3 }
   0x5   : > { %s3604_s18 = smov (%p28_p1, %s26_s18), 0  ;;  %p209_p3 = pnand %p2179_p0, %p208_p2 }
   0x6   : > { %v2913_v0 = vld [vmem:[%s3595_s1 + $0x40] sm:$0xff] (!%p209_p3)   ;;  %p252_p4 = scmp.lt.s32.totalorder (!%p209_p3), %s3023_s15, 1  ;;  %v2915_v2 = vld [vmem:[%s3595_s1 + $0x48] sm:$0xff] (!%p209_p3)   ;;  %v2917_v4 = vld [vmem:[%s3595_s1 + $0x50] sm:$0xff] (!%p209_p3)   ;;  %vm639_vm0 = vsmask.f32 (!%p209_p3), 3328 }
   0x7   : > { %212 = sbr.rel (%p209_p3) target bundleno = 394 (0x18a), region = 36  ;;  %v2914_v1 = vld [vmem:[%s3595_s1 + $0x100] sm:$0xff] (!%p209_p3)   ;;  %2592 = vmatprep.subr.bf16.mxu1 (!%p209_p3), %v2913_v0  ;;  %v2916_v3 = vld [vmem:[%s3595_s1 + $0x108] sm:$0xff] (!%p209_p3)   ;;  %v2918_v5 = vld [vmem:[%s3595_s1 + $0x110] sm:$0xff] (!%p209_p3)   ;;  %vm640_vm1 = vsmask.f32 (!%p209_p3), 7440 }
   0x8   : > { %2688 = vmatprep.subr.bf16.mxu0 (!%p209_p3), %v2914_v1  ;;  %2593 = vmatpush3.bf16.msra.mxu1 (!%p209_p3), %v2913_v0  ;;  %v2919_v6 = vld [vmem:[%s3595_s1 + $0x58] sm:$0xff] (!%p209_p3)   ;;  %v2921_v8 = vld [vmem:[%s3595_s1 + $0x60] sm:$0xff] (!%p209_p3)   ;;  %v2923_v10 = vld [vmem:[%s3595_s1 + $0x68] sm:$0xff] (!%p209_p3)  }
   0x9   : > { %2689 = vmatpush3.bf16.msra.mxu0 (!%p209_p3), %v2914_v1  ;;  %2594 = vmatprep.subr.bf16.mxu1 (!%p209_p3), %v2915_v2  ;;  %v2920_v7 = vld [vmem:[%s3595_s1 + $0x118] sm:$0xff] (!%p209_p3)   ;;  %v2922_v9 = vld [vmem:[%s3595_s1 + $0x120] sm:$0xff] (!%p209_p3)   ;;  %v2924_v14 = vld [vmem:[%s3595_s1 + $0x128] sm:$0xff] (!%p209_p3)  }
   0xa   : > { %2690 = vmatprep.subr.bf16.mxu0 (!%p209_p3), %v2916_v3  ;;  %v2925_v18 = vld [vmem:[%s3595_s1 + $0x70] sm:$0xff] (!%p209_p3)   ;;  %v2927_v20 = vld [vmem:[%s3595_s1 + $0x78] sm:$0xff] (!%p209_p3)   ;;  %v2931_v23 = vld [vmem:[%s3595_s1] sm:$0xff] (!%p209_p3)  }
   0xb   : > { %v2926_v19 = vld [vmem:[%s3595_s1 + $0x130] sm:$0xff] (!%p209_p3)   ;;  %v2928_v21 = vld [vmem:[%s3595_s1 + $0x138] sm:$0xff] (!%p209_p3)   ;;  %v2933_v24 = vld [vmem:[%s3595_s1 + $0x140] sm:$0xff] (!%p209_p3)  }
   0xc   : > { %2595 = vmatpush3.bf16.msra.mxu1 (!%p209_p3), %v2915_v2  ;;  %v2936_v29 = vld [vmem:[%s3595_s1 + $0x8] sm:$0xff] (!%p209_p3)   ;;  %v2938_v36 = vld [vmem:[%s3595_s1 + $0x10] sm:$0xff] (!%p209_p3)   ;;  %v2940_v43 = vld [vmem:[%s3595_s1 + $0x18] sm:$0xff] (!%p209_p3)  }
   0xd   : > { %2691 = vmatpush3.bf16.msra.mxu0 (!%p209_p3), %v2916_v3  ;;  %2596 = vmatprep.subr.bf16.mxu1 (!%p209_p3), %v2917_v4  ;;  %v2937_v31 = vld [vmem:[%s3595_s1 + $0x148] sm:$0xff] (!%p209_p3)   ;;  %v2939_v38 = vld [vmem:[%s3595_s1 + $0x150] sm:$0xff] (!%p209_p3)   ;;  %v2941_v44 = vld [vmem:[%s3595_s1 + $0x158] sm:$0xff] (!%p209_p3)  }
   0xe   : > { %s3606_s15 = smov (!%p252_p4, %s3023_s15), 1  ;;  %2692 = vmatprep.subr.bf16.mxu0 %v2918_v5  ;;  %v2942_v48 = vld [vmem:[%s3595_s1 + $0x20] sm:$0xff]   ;;  %v2944_v63 = vld [vmem:[%s3595_s1 + $0x28] sm:$0xff]   ;;  %vm3233_vm2 = vmor %vm639_vm0, %vm640_vm1 }
   0xf   : > { %s2888_s9 = smul.u32 288, %s3606_s15  ;;  %v2943_v51 = vld [vmem:[%s3595_s1 + $0x160] sm:$0xff]   ;;  %v2945_v0 = vld [vmem:[%s3595_s1 + $0x168] sm:$0xff]   ;;  %s2432_s13 = sshll.u32 %s3606_s15, 5 }
  0x10   : > { %2597 = vmatpush3.bf16.msra.mxu1 %v2917_v4  ;;  %s271_s21 = scalar_lea.vmem %s3597_s3, %s2432_s13  ;;  %s279_s26 = scalar_lea.vmem %s3598_s4, %s2432_s13 }
  0x11   : > { %2693 = vmatpush3.bf16.msra.mxu0 %v2918_v5  ;;  %2598 = vmatprep.subr.bf16.mxu1 %v2919_v6  ;;  %s3112_s20 = scalar_lea.vmem %s3594_s0, %s2888_s9 }
  0x12   : > { %2694 = vmatprep.subr.bf16.mxu0 %v2920_v7  ;;  %v299_v11 = vld [vmem:[%s3112_s20 + $0x48] sm:$0xf]  ;;  %v3119_v12 = vld [vmem:[%s3112_s20 + $0x50] sm:$0xf]  ;;  %v3122_v13 = vld [vmem:[%s3112_s20 + $0x58] sm:$0xf] }
  0x13   : > { %v2201_v15 = vcombine.low %v299_v11, %v3119_v12  ;;  %v2381_v16 = vcombine.low %v3119_v12, %v3122_v13  ;;  %v2932_v17 = vld [vmem:[%s3112_s20 + $0xd8] ss:$8 sps:$4 sm:$0xff]   ;;  %v2935_v26 = vld [vmem:[%s3112_s20 + $0xe8] ss:$8 sps:$4 sm:$0xff]   ;;  %v309_v47 = vld [vmem:[%s3112_s20 + $0x94] sm:$0xf] }
  0x14   : > { %2599 = vmatpush3.bf16.msra.mxu1 %v2919_v6  ;;  %2704 = vmatprep.mubr.bf16.mxu0 %v2932_v17  ;;  %v3144_v22 = vld [vmem:[%s3112_s20 + $0x60] sm:$0xf]  ;;  %v3156_v27 = vld [vmem:[%s3112_s20 + $0x68] sm:$0xf]  ;;  %v3159_v28 = vld [vmem:[%s3112_s20 + $0x70] sm:$0xf] }
  0x15   : > { %2695 = vmatpush3.bf16.msra.mxu0 %v2920_v7  ;;  %2600 = vmatprep.subr.bf16.mxu1 %v2921_v8  ;;  %v2202_v25 = vcombine.low %v3122_v13, %v3144_v22  ;;  %v2382_v30 = vcombine.low %v3144_v22, %v3156_v27  ;;  %v2203_v32 = vcombine.low %v3156_v27, %v3159_v28  ;;  %v2949_v33 = vld [vmem:[%s3112_s20 + $0xf8] ss:$8 sps:$4 sm:$0xff]   ;;  %v2952_v41 = vld [vmem:[%s3112_s20 + $0x108] ss:$8 sps:$4 sm:$0xff]   ;;  %v311_v50 = vld [vmem:[%s3112_s20 + $0x9c] sm:$0xf] }
  0x16   : > { %2696 = vmatprep.subr.bf16.mxu0 %v2922_v9  ;;  %2608 = vmatprep.mubr.bf16.mxu1 %v2201_v15  ;;  %v3173_v34 = vld [vmem:[%s3112_s20 + $0x78] sm:$0xf]  ;;  %v3176_v35 = vld [vmem:[%s3112_s20 + $0x80] sm:$0xf]  ;;  %v3193_v42 = vld [vmem:[%s3112_s20 + $0x8] sm:$0xf] }
  0x17   : > { %v2383_v37 = vcombine.low %v3159_v28, %v3173_v34  ;;  %v2204_v39 = vcombine.low %v3173_v34, %v3176_v35  ;;  %v3189_v40 = vld [vmem:[%s3112_s20] sm:$0xf]  ;;  %v3204_v46 = vld [vmem:[%s3112_s20 + $0x90] sm:$0xf]  ;;  %v3211_v49 = vld [vmem:[%s3112_s20 + $0x98] sm:$0xf] }
  0x18   : > { %2601 = vmatpush3.bf16.msra.mxu1 %v2921_v8  ;;  %v2213_v45 = vcombine.low %v3189_v40, %v3193_v42  ;;  %v1233_v52 = vshrl.u32 %v3204_v46, 16  ;;  %v1236_v53 = vshll.u32 %v3204_v46, 16  ;;  %v1242_v54 = vshll.u32 %v309_v47, 16  ;;  %v3229_v3 = vld [vmem:[%s3112_s20 + $0xa0] sm:$0xf]  ;;  %v2990_v12 = vld [vmem:[%s3595_s1 + $0xf0] sm:$0xff]  }
  0x19   : > { %2697 = vmatpush3.bf16.msra.mxu0 %v2922_v9  ;;  %2602 = vmatprep.subr.bf16.mxu1 %v2923_v10  ;;  %v643_v55 = vshrl.u32 %v3189_v40, 16  ;;  %v1247_v56 = vshrl.u32 %v3211_v49, 16  ;;  %v1250_v57 = vshll.u32 %v3211_v49, 16  ;;  %v1256_v58 = vshll.u32 %v311_v50, 16  ;;  %v313_v8 = vld [vmem:[%s3112_s20 + $0xa4] sm:$0xf] }
  0x1a   : > { %2698 = vmatprep.subr.bf16.mxu0 %v2924_v14  ;;  %v1235_v59 = vrot.slane %v1233_v52, 4  ;;  %v1238_v60 = vrot.slane %v1236_v53, 5  ;;  %v1244_v2 = vrot.slane %v1242_v54, 5  ;;  %v646_v4 = vshll.u32 %v3189_v40, 16  ;;  %v3239_v9 = vld [vmem:[%s3112_s20 + $0xa8] sm:$0xf] }
  0x1b   : > { %v1249_v61 = vrot.slane %v1247_v56, 4  ;;  %v1252_v62 = vrot.slane %v1250_v57, 5  ;;  %v1258_v7 = vrot.slane %v1256_v58, 5  ;;  %v1261_v15 = vshrl.u32 %v3229_v3, 16  ;;  %v3269_v52 = vld [vmem:[%s3112_s20 + $0x10] sm:$0xf] }
  0x1c   : > { %2603 = vmatpush3.bf16.msra.mxu1 %v2923_v10  ;;  %v1239_v1 = vor.u32 %v1238_v60, %v1235_v59  ;;  %v3241_v10 = vrot.slane %v643_v55, 4  ;;  %v1264_v17 = vshll.u32 %v3229_v3, 16  ;;  %v3272_v53 = vld [vmem:[%s3112_s20 + $0x18] sm:$0xf]  ;;  %v657_v54 = vshrl.u32 %v3193_v42, 16  ;;  %v2956_v56 = vld [vmem:[%s3595_s1 + $0x80] sm:$0xff]  }
  0x1d   : > { %2699 = vmatpush3.bf16.msra.mxu0 %v2924_v14  ;;  %2604 = vmatprep.subr.bf16.mxu1 %v2925_v18  ;;  %v1253_v6 = vor.u32 %v1252_v62, %v1249_v61  ;;  %v315_v14 = vld [vmem:[%s3112_s20 + $0xac] sm:$0xf]  ;;  %v660_v55 = vshll.u32 %v3193_v42, 16  ;;  %v2957_v57 = vld [vmem:[%s3595_s1 + $0x180] sm:$0xff]   ;;  %v671_v60 = vshrl.u32 %v3269_v52, 16  ;;  %v674_v61 = vshll.u32 %v3269_v52, 16 }
  0x1e   : > { %2700 = vmatprep.subr.bf16.mxu0 %v2926_v19  ;;  %v1240_v11 = vrot.slane %v1239_v1, 4  ;;  %v3289_v62 = vld [vmem:[%s3112_s20 + $0x20] sm:$0xf]  ;;  %v3297_v1 = vld [vmem:[%s3112_s20 + $0x28] sm:$0xf]  ;;  %v2992_v13 = vld [vmem:[%s3595_s1 + $0x1f0] sm:$0xff]  }
  0x1f   : > { %v3004_v27 = vld [vmem:[%s3595_s1 + $0x218] sm:$0xff]  }
  0x20   : > { %2605 = vmatpush3.bf16.msra.mxu1 %v2925_v18  ;;  %v1254_v18 = vrot.slane %v1253_v6, 4 }
  0x21   : > { %2701 = vmatpush3.bf16.msra.mxu0 %v2926_v19  ;;  %2606 = vmatprep.subr.bf16.mxu1 %v2927_v20  ;;  %v1270_v19 = vshll.u32 %v313_v8, 16  ;;  %v3307_v8 = vld [vmem:[%s3112_s20 + $0xb8] sm:$0xf] }
  0x22   : > { %2702 = vmatprep.subr.bf16.mxu0 %v2928_v21 }
  0x23   : > { %v1272_v47 = vrot.slane %v1270_v19, 5  ;;  %v1303_v19 = vshrl.u32 %v3307_v8, 16 }
  0x24   : > { %2607 = vmatpush3.bf16.msra.mxu1 %v2927_v20  ;;  %v1275_v20 = vshrl.u32 %v3239_v9, 16 }
  0x25   : > { %2703 = vmatpush3.bf16.msra.mxu0 %v2928_v21  ;;  %2616 = vmatprep.subr.bf16.mxu1 %v2931_v23  ;;  %v1278_v21 = vshll.u32 %v3239_v9, 16 }
  0x26   : > { %2712 = vmatprep.subr.bf16.mxu0 %v2933_v24 }
  0x27   : > { %2609 = vmatmul.mubr.bf16.vlgmr.msra.gmra.mrb[0].mxu1 %v2202_v25  ;;  %v1263_v25 = vrot.slane %v1261_v15, 4 }
  0x28   : > { %2617 = vmatpush3.bf16.msra.mxu1 %v2931_v23  ;;  %2705 = vmatmul.mubr.bf16.vlgmr.msra.gmra.mrb[0].mxu0 %v2935_v26  ;;  %v2948_v23 = vld [vmem:[%s3595_s1 + $0x30] sm:$0xff]   ;;  %v1266_v26 = vrot.slane %v1264_v17, 5 }
  0x29   : > { %2713 = vmatpush3.bf16.msra.mxu0 %v2933_v24  ;;  %2618 = vmatprep.subr.bf16.mxu1 %v2936_v29  ;;  %v1245_v24 = vsel %vm3233_vm2, %v1240_v11, %v1244_v2  ;;  %v3300_v2 = vld [vmem:[%s3112_s20 + $0xb0] sm:$0xf]  ;;  %v319_v11 = vld [vmem:[%s3112_s20 + $0xbc] sm:$0xf] }
  0x2a   : > { %2714 = vmatprep.subr.bf16.mxu0 %v2937_v31  ;;  %2612 = vmatprep.mubr.bf16.mxu1 %v2203_v32  ;;  %v3256_v32 = vrot.slane %v646_v4, 5  ;;  %v1267_v40 = vor.u32 %v1266_v26, %v1263_v25  ;;  %v317_v4 = vld [vmem:[%s3112_s20 + $0xb4] sm:$0xf]  ;;  %v1292_v15 = vshll.u32 %v3300_v2, 16  ;;  %v3319_v26 = vld [vmem:[%s3112_s20 + $0x30] sm:$0xf] }
  0x2b   : > { %2708 = vmatprep.mubr.bf16.mxu0 %v2949_v33  ;;  %v1259_v33 = vsel %vm3233_vm2, %v1254_v18, %v1258_v7  ;;  %v2960_v7 = vld [vmem:[%s3595_s1 + $0x188] sm:$0xff]   ;;  %v1298_v18 = vshll.u32 %v317_v4, 16 }
  0x2c   : > { %2619 = vmatpush3.bf16.msra.mxu1 %v2936_v29  ;;  %v1284_v29 = vshll.u32 %v315_v14, 16  ;;  %v1268_v50 = vrot.slane %v1267_v40, 4  ;;  %v1289_v14 = vshrl.u32 %v3300_v2, 16  ;;  %v649_v17 = vor.u32 %v3256_v32, %v3241_v10  ;;  %v2961_v32 = vld [vmem:[%s3595_s1 + $0x90] sm:$0xff]  }
  0x2d   : > { %2715 = vmatpush3.bf16.msra.mxu0 %v2937_v31  ;;  %2620 = vmatprep.subr.bf16.mxu1 %v2938_v36  ;;  %v2950_v31 = vld [vmem:[%s3595_s1 + $0x170] sm:$0xff]   ;;  %v1294_v25 = vrot.slane %v1292_v15, 5  ;;  %v2271_v10 = vcombine.low %v3300_v2, %v3307_v8  ;;  %v3006_v2 = vld [vmem:[%s3595_s1 + $0x228] sm:$0xff]  }
  0x2e   : > { %2716 = vmatprep.subr.bf16.mxu0 %v2939_v38  ;;  %v1273_v58 = vsel %vm3233_vm2, %v1268_v50, %v1272_v47  ;;  %v3338_v47 = vrot.slane %v649_v17, 4 }
  0x2f   : > { %2613 = vmatmul.mubr.bf16.gmra.mrb[4].mxu1 %v2204_v39  ;;  %v2325_v39 = vcombine.low %v1245_v24, %v1259_v33  ;;  %v1291_v24 = vrot.slane %v1289_v14, 4  ;;  %v1305_v33 = vrot.slane %v1303_v19, 4 }
  0x30   : > { %2621 = vmatpush3.bf16.msra.mxu1 %v2938_v36  ;;  %2709 = vmatmul.mubr.bf16.gmra.mrb[4].mxu0 %v2952_v41  ;;  %v1277_v36 = vrot.slane %v1275_v20, 4  ;;  %v2270_v41 = vcombine.low %v3229_v3, %v3239_v9  ;;  %v1306_v20 = vshll.u32 %v3307_v8, 16 }
  0x31   : > { %2717 = vmatpush3.bf16.msra.mxu0 %v2939_v38  ;;  %2622 = vmatprep.subr.bf16.mxu1 %v2940_v43  ;;  %v1280_v38 = vrot.slane %v1278_v21, 5  ;;  %v1312_v21 = vshll.u32 %v319_v11, 16  ;;  %v1295_v40 = vor.u32 %v1294_v25, %v1291_v24 }
  0x32   : > { %2718 = vmatprep.subr.bf16.mxu0 %v2941_v44  ;;  %2632 = vmatprep.mubr.bf16.mxu1 %v2213_v45  ;;  %v2954_v45 = vld [vmem:[%s3595_s1 + $0x178] sm:$0xff]  }
  0x33   : > { %2728 = vmatprep.mubr.bf16.mxu0 %v2325_v39  ;;  %v2962_v39 = vld [vmem:[%s3595_s1 + $0x190] sm:$0xff]   ;;  %v1314_v50 = vrot.slane %v1312_v21, 5  ;;  %v2963_v21 = vld [vmem:[%s3595_s1 + $0x98] sm:$0xff]  }
  0x34   : > { %2623 = vmatpush3.bf16.msra.mxu1 %v2940_v43  ;;  %v2953_v43 = vld [vmem:[%s3595_s1 + $0x38] sm:$0xff]  }
  0x35   : > { %2719 = vmatpush3.bf16.msra.mxu0 %v2941_v44  ;;  %2624 = vmatprep.subr.bf16.mxu1 %v2942_v48  ;;  %v1281_v44 = vor.u32 %v1280_v38, %v1277_v36  ;;  %v1308_v36 = vrot.slane %v1306_v20, 5  ;;  %v3329_v38 = vld [vmem:[%s3112_s20 + $0x38] sm:$0xf] }
  0x36   : > { %2720 = vmatprep.subr.bf16.mxu0 %v2943_v51 }
  0x38   : > { %2625 = vmatpush3.bf16.msra.mxu1 %v2942_v48  ;;  %v1286_v48 = vrot.slane %v1284_v29, 5  ;;  %v685_v29 = vshrl.u32 %v3272_v53, 16 }
  0x39   : > { %2721 = vmatpush3.bf16.msra.mxu0 %v2943_v51  ;;  %2626 = vmatprep.subr.bf16.mxu1 %v2944_v63  ;;  %v1282_v51 = vrot.slane %v1281_v44, 4  ;;  %v3335_v44 = vld [vmem:[%s3112_s20 + $0xc0] sm:$0xf] }
  0x3a   : > { %2722 = vmatprep.subr.bf16.mxu0 %v2945_v0  ;;  %v1317_v4 = vshrl.u32 %v3335_v44, 16 }
  0x3b   : > { %v1287_v59 = vsel %vm3233_vm2, %v1282_v51, %v1286_v48  ;;  %v1309_v48 = vor.u32 %v1308_v36, %v1305_v33  ;;  %v2216_v51 = vcombine.low %v3319_v26, %v3329_v38  ;;  %v2964_v33 = vld [vmem:[%s3595_s1 + $0x198] sm:$0xff]  }
  0x3c   : > { %2627 = vmatpush3.bf16.msra.mxu1 %v2944_v63  ;;  %v2214_v63 = vcombine.low %v3269_v52, %v3272_v53  ;;  %v2326_v6 = vcombine.low %v1273_v58, %v1287_v59  ;;  %v323_v58 = vld [vmem:[%s3112_s20 + $0xcc] sm:$0xf]  ;;  %v659_v59 = vrot.slane %v657_v54, 4  ;;  %v1319_v54 = vrot.slane %v1317_v4, 4  ;;  %v2965_v4 = vld [vmem:[%s3595_s1 + $0xa0] sm:$0xff]  }
  0x3d   : > { %2723 = vmatpush3.bf16.msra.mxu0 %v2945_v0  ;;  %2628 = vmatprep.subr.bf16.mxu1 %v2948_v23  ;;  %v2959_v0 = vld [vmem:[%s3595_s1 + $0x88] sm:$0xff]   ;;  %v1310_v14 = vrot.slane %v1309_v48, 4  ;;  %v1340_v17 = vshll.u32 %v323_v58, 16 }
  0x3e   : > { %2724 = vmatprep.subr.bf16.mxu0 %v2950_v31 }
  0x40   : > { %2629 = vmatpush3.bf16.msra.mxu1 %v2948_v23  ;;  %v2215_v23 = vcombine.low %v3289_v62, %v3297_v1 }
  0x41   : > { %2725 = vmatpush3.bf16.msra.mxu0 %v2950_v31  ;;  %2630 = vmatprep.subr.bf16.mxu1 %v2953_v43  ;;  %v688_v31 = vshll.u32 %v3272_v53, 16 }
  0x42   : > { %2726 = vmatprep.subr.bf16.mxu0 %v2954_v45 }
  0x44   : > { %2631 = vmatpush3.bf16.msra.mxu1 %v2953_v43  ;;  %v1300_v43 = vrot.slane %v1298_v18, 5 }
  0x45   : > { %2727 = vmatpush3.bf16.msra.mxu0 %v2954_v45  ;;  %2640 = vmatprep.subr.bf16.mxu1 %v2956_v56  ;;  %v321_v45 = vld [vmem:[%s3112_s20 + $0xc4] sm:$0xf] }
  0x46   : > { %2736 = vmatprep.subr.bf16.mxu0 %v2957_v57  ;;  %v1326_v11 = vshll.u32 %v321_v45, 16  ;;  %v662_v45 = vrot.slane %v660_v55, 5  ;;  %v2353_v55 = vcombine.low %v3193_v42, %v3269_v52  ;;  %v2968_v52 = vld [vmem:[%s3595_s1 + $0x1a8] sm:$0xff]  }
  0x47   : > { %2633 = vmatmul.mubr.bf16.vlgmr.msra.gmra.mrb[0].mxu1 %v2214_v63  ;;  %v1296_v63 = vrot.slane %v1295_v40, 4 }
  0x48   : > { %2641 = vmatpush3.bf16.msra.mxu1 %v2956_v56  ;;  %2729 = vmatmul.mubr.bf16.vlgmr.msra.gmra.mrb[0].mxu0 %v2326_v6  ;;  %v3343_v56 = vld [vmem:[%s3112_s20 + $0xc8] sm:$0xf]  ;;  %v1320_v6 = vshll.u32 %v3335_v44, 16  ;;  %v1328_v20 = vrot.slane %v1326_v11, 5  ;;  %v663_v11 = vor.u32 %v662_v45, %v659_v59  ;;  %v2970_v45 = vld [vmem:[%s3595_s1 + $0xb0] sm:$0xff]  }
  0x49   : > { %2737 = vmatpush3.bf16.msra.mxu0 %v2957_v57  ;;  %2642 = vmatprep.subr.bf16.mxu1 %v2959_v0  ;;  %v1331_v57 = vshrl.u32 %v3343_v56, 16  ;;  %v1334_v15 = vshll.u32 %v3343_v56, 16  ;;  %v1301_v18 = vsel %vm3233_vm2, %v1296_v63, %v1300_v43  ;;  %v282_v43 = vld [vmem:[%s3112_s20 + $0x4] sm:$0xf]  ;;  %v2272_v48 = vcombine.low %v3335_v44, %v3343_v56  ;;  %v3007_v44 = vld [vmem:[%s3595_s1 + $0x230] sm:$0xff]  }
  0x4a   : > { %2738 = vmatprep.subr.bf16.mxu0 %v2960_v7  ;;  %2636 = vmatprep.mubr.bf16.mxu1 %v2215_v23  ;;  %v1322_v19 = vrot.slane %v1320_v6, 5  ;;  %v1315_v23 = vsel %vm3233_vm2, %v1310_v14, %v1314_v50  ;;  %v652_v58 = vshll.u32 %v282_v43, 16  ;;  %v664_v42 = vrot.slane %v663_v11, 4 }
  0x4b   : > { %v1333_v24 = vrot.slane %v1331_v57, 4  ;;  %v1336_v25 = vrot.slane %v1334_v15, 5  ;;  %v2327_v36 = vcombine.low %v1301_v18, %v1315_v23  ;;  %v286_v15 = vld [vmem:[%s3112_s20 + $0x14] sm:$0xf]  ;;  %v699_v18 = vshrl.u32 %v3289_v62, 16 }
  0x4c   : > { %2643 = vmatpush3.bf16.msra.mxu1 %v2959_v0  ;;  %v1342_v0 = vrot.slane %v1340_v17, 5  ;;  %v1323_v40 = vor.u32 %v1322_v19, %v1319_v54  ;;  %v654_v57 = vrot.slane %v652_v58, 5  ;;  %v2966_v17 = vld [vmem:[%s3595_s1 + $0x1a0] sm:$0xff]   ;;  %v676_v54 = vrot.slane %v674_v61, 5  ;;  %v2967_v19 = vld [vmem:[%s3595_s1 + $0xa8] sm:$0xff]   ;;  %v2971_v58 = vld [vmem:[%s3595_s1 + $0x1b0] sm:$0xff]  }
  0x4d   : > { %2739 = vmatpush3.bf16.msra.mxu0 %v2960_v7  ;;  %2644 = vmatprep.subr.bf16.mxu1 %v2961_v32  ;;  %v284_v7 = vld [vmem:[%s3112_s20 + $0xc] sm:$0xf]  ;;  %v1337_v50 = vor.u32 %v1336_v25, %v1333_v24  ;;  %v687_v24 = vrot.slane %v685_v29, 4  ;;  %v702_v61 = vshll.u32 %v3289_v62, 16  ;;  %v713_v29 = vshrl.u32 %v3297_v1, 16 }
  0x4e   : > { %2740 = vmatprep.subr.bf16.mxu0 %v2962_v39  ;;  %v666_v63 = vshll.u32 %v284_v7, 16  ;;  %2732 = vmatprep.mubr.bf16.mxu0 %v2327_v36  ;;  %v1324_v6 = vrot.slane %v1323_v40, 4  ;;  %v655_v23 = vsel %vm3233_vm2, %v3338_v47, %v654_v57  ;;  %v680_v36 = vshll.u32 %v286_v15, 16 }
  0x4f   : > { %2637 = vmatmul.mubr.bf16.gmra.mrb[4].mxu1 %v2216_v51  ;;  %v1338_v14 = vrot.slane %v1337_v50, 4  ;;  %v716_v47 = vshll.u32 %v3297_v1, 16  ;;  %v727_v40 = vshrl.u32 %v3319_v26, 16  ;;  %v730_v43 = vshll.u32 %v3319_v26, 16 }
  0x50   : > { %2645 = vmatpush3.bf16.msra.mxu1 %v2961_v32  ;;  %v668_v51 = vrot.slane %v666_v63, 5  ;;  %v673_v32 = vrot.slane %v671_v60, 4  ;;  %v1329_v59 = vsel %vm3233_vm2, %v1324_v6, %v1328_v20  ;;  %v690_v20 = vrot.slane %v688_v31, 5 }
  0x51   : > { %2741 = vmatpush3.bf16.msra.mxu0 %v2962_v39  ;;  %2646 = vmatprep.subr.bf16.mxu1 %v2963_v21  ;;  %v288_v39 = vld [vmem:[%s3112_s20 + $0x1c] sm:$0xf]  ;;  %v1343_v60 = vsel %vm3233_vm2, %v1338_v14, %v1342_v0  ;;  %v682_v63 = vrot.slane %v680_v36, 5  ;;  %v701_v6 = vrot.slane %v699_v18, 4  ;;  %v704_v14 = vrot.slane %v702_v61, 5 }
  0x52   : > { %2742 = vmatprep.subr.bf16.mxu0 %v2964_v33  ;;  %v2328_v25 = vcombine.low %v1329_v59, %v1343_v60  ;;  %v3401_v0 = vsel %vm3233_vm2, %v664_v42, %v668_v51  ;;  %v691_v7 = vor.u32 %v690_v20, %v687_v24  ;;  %v694_v50 = vshll.u32 %v288_v39, 16  ;;  %v2974_v18 = vld [vmem:[%s3595_s1 + $0x1b8] sm:$0xff]   ;;  %v290_v59 = vld [vmem:[%s3112_s20 + $0x24] sm:$0xf]  ;;  %v292_v42 = vld [vmem:[%s3112_s20 + $0x2c] sm:$0xf] }
  0x53   : > { %v2241_v31 = vcombine.low %v655_v23, %v3401_v0  ;;  %v715_v51 = vrot.slane %v713_v29, 4  ;;  %v708_v60 = vshll.u32 %v290_v59, 16  ;;  %v722_v23 = vshll.u32 %v292_v42, 16  ;;  %v294_v24 = vld [vmem:[%s3112_s20 + $0x34] sm:$0xf] }
  0x54   : > { %2647 = vmatpush3.bf16.msra.mxu1 %v2963_v21  ;;  %v677_v21 = vor.u32 %v676_v54, %v673_v32  ;;  %2733 = vmatmul.mubr.bf16.gmra.mrb[4].mxu0 %v2328_v25  ;;  %v692_v57 = vrot.slane %v691_v7, 4  ;;  %v696_v15 = vrot.slane %v694_v50, 5  ;;  %v705_v32 = vor.u32 %v704_v14, %v701_v6  ;;  %v296_v20 = vld [vmem:[%s3112_s20 + $0x3c] sm:$0xf]  ;;  %v2977_v6 = vld [vmem:[%s3595_s1 + $0x1c0] sm:$0xff]  }
  0x55   : > { %2743 = vmatpush3.bf16.msra.mxu0 %v2964_v33  ;;  %2648 = vmatprep.subr.bf16.mxu1 %v2965_v4  ;;  %v741_v33 = vshrl.u32 %v3329_v38, 16  ;;  %v729_v54 = vrot.slane %v727_v40, 4  ;;  %v732_v36 = vrot.slane %v730_v43, 5  ;;  %v710_v29 = vrot.slane %v708_v60, 5  ;;  %v2975_v40 = vld [vmem:[%s3595_s1 + $0xc0] sm:$0xff]  }
  0x56   : > { %2744 = vmatprep.subr.bf16.mxu0 %v2966_v17  ;;  %2656 = vmatprep.mubr.bf16.mxu1 %v2241_v31  ;;  %v678_v11 = vrot.slane %v677_v21, 4  ;;  %v706_v61 = vrot.slane %v705_v32, 4  ;;  %v736_v31 = vshll.u32 %v294_v24, 16  ;;  %v3474_v59 = vld [vmem:[%s3112_s20 + $0x40] sm:$0xf]  ;;  %v2269_v60 = vcombine.low %v3204_v46, %v3211_v49  ;;  %v2987_v46 = vld [vmem:[%s3595_s1 + $0xe8] sm:$0xff]  }
  0x57   : > { %2752 = vmatprep.mubr.bf16.mxu0 %v2353_v55  ;;  %v718_v55 = vrot.slane %v716_v47, 5  ;;  %v724_v47 = vrot.slane %v722_v23, 5  ;;  %v743_v21 = vrot.slane %v741_v33, 4  ;;  %v733_v7 = vor.u32 %v732_v36, %v729_v54  ;;  %v2984_v54 = vld [vmem:[%s3595_s1 + $0x1d8] sm:$0xff]   ;;  %v2986_v23 = vld [vmem:[%s3595_s1 + $0x1e0] sm:$0xff]   ;;  %v2988_v49 = vld [vmem:[%s3595_s1 + $0x1e8] sm:$0xff]  }
  0x58   : > { %2649 = vmatpush3.bf16.msra.mxu1 %v2965_v4  ;;  %v744_v4 = vshll.u32 %v3329_v38, 16  ;;  %v2356_v42 = vcombine.low %v3329_v38, %v3474_v59  ;;  %v2985_v38 = vld [vmem:[%s3595_s1 + $0xe0] sm:$0xff]   ;;  %v2994_v24 = vld [vmem:[%s3595_s1 + $0x1f8] sm:$0xff]   ;;  %v3003_v36 = vld [vmem:[%s3595_s1 + $0x210] sm:$0xff]   ;;  %v1795_v34 = vshrl.u32 %v3474_v59, 16 }
  0x59   : > { %2745 = vmatpush3.bf16.msra.mxu0 %v2966_v17  ;;  %2650 = vmatprep.subr.bf16.mxu1 %v2967_v19  ;;  %v2973_v17 = vld [vmem:[%s3595_s1 + $0xb8] sm:$0xff]   ;;  %v719_v39 = vor.u32 %v718_v55, %v715_v51  ;;  %v734_v14 = vrot.slane %v733_v7, 4  ;;  %v2980_v55 = vld [vmem:[%s3595_s1 + $0x1c8] sm:$0xff]  }
  0x5a   : > { %2746 = vmatprep.subr.bf16.mxu0 %v2968_v52  ;;  %v746_v50 = vrot.slane %v744_v4, 5  ;;  %v1797_v3 = vrot.slane %v1795_v34, 4 }
  0x5b   : > { %v720_v25 = vrot.slane %v719_v39, 4  ;;  %v2983_v39 = vld [vmem:[%s3595_s1 + $0xd8] sm:$0xff]  }
  0x5c   : > { %2651 = vmatpush3.bf16.msra.mxu1 %v2967_v19  ;;  %v3426_v19 = vsel %vm3233_vm2, %v678_v11, %v682_v63  ;;  %v750_v63 = vshll.u32 %v296_v20, 16  ;;  %v2354_v11 = vcombine.low %v3272_v53, %v3289_v62  ;;  %v2355_v53 = vcombine.low %v3297_v1, %v3319_v26  ;;  %v2981_v62 = vld [vmem:[%s3595_s1 + $0xd0] sm:$0xff]   ;;  %v2997_v20 = vld [vmem:[%s3595_s1 + $0x200] sm:$0xff]  }
  0x5d   : > { %2747 = vmatpush3.bf16.msra.mxu0 %v2968_v52  ;;  %2652 = vmatprep.subr.bf16.mxu1 %v2970_v45  ;;  %v3432_v52 = vsel %vm3233_vm2, %v692_v57, %v696_v15  ;;  %v3448_v33 = vsel %vm3233_vm2, %v720_v25, %v724_v47  ;;  %v738_v57 = vrot.slane %v736_v31, 5  ;;  %v2979_v15 = vld [vmem:[%s3595_s1 + $0xc8] sm:$0xff]   ;;  %v2982_v1 = vld [vmem:[%s3595_s1 + $0x1d0] sm:$0xff]  }
  0x5e   : > { %2748 = vmatprep.subr.bf16.mxu0 %v2971_v58  ;;  %v2242_v43 = vcombine.low %v3426_v19, %v3432_v52  ;;  %v752_v51 = vrot.slane %v750_v63, 5  ;;  %v307_v25 = vld [vmem:[%s3112_s20 + $0x88] sm:$0xf] }
  0x5f   : > { %v2384_v22 = vcombine.low %v3176_v35, %v307_v25  ;;  %v1798_v35 = vshll.u32 %v3474_v59, 16 }
  0x60   : > { %2653 = vmatpush3.bf16.msra.mxu1 %v2970_v45  ;;  %v3444_v45 = vsel %vm3233_vm2, %v706_v61, %v710_v29  ;;  %v2998_v61 = vld [vmem:[%s3595_s1 + $0x208] sm:$0xff]  }
  0x61   : > { %2749 = vmatpush3.bf16.msra.mxu0 %v2971_v58  ;;  %2654 = vmatprep.subr.bf16.mxu1 %v2973_v17  ;;  %v747_v58 = vor.u32 %v746_v50, %v743_v21  ;;  %v2243_v4 = vcombine.low %v3444_v45, %v3448_v33  ;;  %v1800_v9 = vrot.slane %v1798_v35, 5  ;;  %v2410_v47 = vcombine.low %v3432_v52, %v3444_v45 }
  0x62   : > { %2750 = vmatprep.subr.bf16.mxu0 %v2974_v18 }
  0x63   : > { %v748_v32 = vrot.slane %v747_v58, 4  ;;  %v1801_v8 = vor.u32 %v1800_v9, %v1797_v3 }
  0x64   : > { %2655 = vmatpush3.bf16.msra.mxu1 %v2973_v17  ;;  %v3467_v17 = vsel %vm3233_vm2, %v734_v14, %v738_v57 }
  0x65   : > { %2751 = vmatpush3.bf16.msra.mxu0 %v2974_v18  ;;  %2664 = vmatprep.subr.bf16.mxu1 %v2975_v40  ;;  %v3471_v18 = vsel %vm3233_vm2, %v748_v32, %v752_v51  ;;  %v2411_v28 = vcombine.low %v3448_v33, %v3467_v17  ;;  %v1802_v56 = vrot.slane %v1801_v8, 4  ;;  %v2478_v51 = vld [vmem:[%s271_s21 + $0x8] sm:$0xff]   ;;  %v2443_v32 = vld [vmem:[%s271_s21] sm:$0xff]  }
  0x66   : > { %2760 = vmatprep.subr.bf16.mxu0 %v2977_v6  ;;  %v2244_v26 = vcombine.low %v3467_v17, %v3471_v18 }
  0x67   : > { %2657 = vmatmul.mubr.bf16.vlgmr.msra.gmra.mrb[0].mxu1 %v2242_v43 }
  0x68   : > { %2665 = vmatpush3.bf16.msra.mxu1 %v2975_v40  ;;  %2753 = vmatmul.mubr.bf16.vlgmr.msra.gmra.mrb[0].mxu0 %v2354_v11 }
  0x69   : > { %2761 = vmatpush3.bf16.msra.mxu0 %v2977_v6  ;;  %2666 = vmatprep.subr.bf16.mxu1 %v2979_v15 }
  0x6a   : > { %2762 = vmatprep.subr.bf16.mxu0 %v2980_v55  ;;  %2660 = vmatprep.mubr.bf16.mxu1 %v2243_v4  ;;  %v2448_v4 = vunpack.c.l.bf16 %v2478_v51 }
  0x6b   : > { %2756 = vmatprep.mubr.bf16.mxu0 %v2355_v53 }
  0x6c   : > { %2667 = vmatpush3.bf16.msra.mxu1 %v2979_v15  ;;  %v2480_v15 = vld [vmem:[%s271_s21 + $0x18] sm:$0xff]  }
  0x6d   : > { %2763 = vmatpush3.bf16.msra.mxu0 %v2980_v55  ;;  %2668 = vmatprep.subr.bf16.mxu1 %v2981_v62  ;;  %v2479_v55 = vld [vmem:[%s271_s21 + $0x10] sm:$0xff]   ;;  %v2456_v53 = vunpack.c.l.bf16 %v2480_v15  ;;  %v2457_v59 = vunpack.c.h.bf16 %v2480_v15 }
  0x6e   : > { %2764 = vmatprep.subr.bf16.mxu0 %v2982_v1  ;;  %v2452_v17 = vunpack.c.l.bf16 %v2479_v55 }
  0x6f   : > { %2661 = vmatmul.mubr.bf16.gmra.mrb[4].mxu1 %v2244_v26  ;;  %v2453_v26 = vunpack.c.h.bf16 %v2479_v55  ;;  %v2001_v25 = vmul.f32 1.4285715, %v2457_v59 }
  0x70   : > { %2669 = vmatpush3.bf16.msra.mxu1 %v2981_v62  ;;  %2757 = vmatmul.mubr.bf16.gmra.mrb[4].mxu0 %v2356_v42  ;;  %v2444_v62 = vunpack.c.l.bf16 %v2443_v32  ;;  %v1996_v42 = vmul.f32 1.4285715, %v2448_v4 }
  0x71   : > { %2765 = vmatpush3.bf16.msra.mxu0 %v2982_v1  ;;  %2670 = vmatprep.subr.bf16.mxu1 %v2983_v39  ;;  %v2421_v1 = vld [vmem:[%s3596_s2] ss:$0 sm:$0xff]  ;;  %v1999_v34 = vmul.f32 1.4285715, %v2453_v26 }
  0x72   : > { %2766 = vmatprep.subr.bf16.mxu0 %v2984_v54  ;;  %2680 = vmatprep.mubr.bf16.mxu1 %v2269_v60 }
  0x73   : > { %2776 = vmatprep.mubr.bf16.mxu0 %v2381_v16  ;;  %v2993_v16 = vld [vmem:[%s3595_s1 + $0xf8] sm:$0xff]  }
  0x74   : > { %2671 = vmatpush3.bf16.msra.mxu1 %v2983_v39 }
  0x75   : > { %2767 = vmatpush3.bf16.msra.mxu0 %v2984_v54  ;;  %2672 = vmatprep.subr.bf16.mxu1 %v2985_v38  ;;  %v2000_v54 = vmul.f32 1.4285715, %v2456_v53 }
  0x76   : > { %2768 = vmatprep.subr.bf16.mxu0 %v2986_v23 }
  0x78   : > { %2673 = vmatpush3.bf16.msra.mxu1 %v2985_v38 }
  0x79   : > { %2769 = vmatpush3.bf16.msra.mxu0 %v2986_v23  ;;  %2674 = vmatprep.subr.bf16.mxu1 %v2987_v46  ;;  %v1994_v23 = vmul.f32 1.4285715, %v2444_v62 }
  0x7a   : > { %2770 = vmatprep.subr.bf16.mxu0 %v2988_v49 }
  0x7c   : > { %2675 = vmatpush3.bf16.msra.mxu1 %v2987_v46 }
  0x7d   : > { %2771 = vmatpush3.bf16.msra.mxu0 %v2988_v49  ;;  %2676 = vmatprep.subr.bf16.mxu1 %v2990_v12  ;;  %v1998_v49 = vmul.f32 1.4285715, %v2452_v17 }
  0x7e   : > { %2772 = vmatprep.subr.bf16.mxu0 %v2992_v13 }
  0x80   : > { %2677 = vmatpush3.bf16.msra.mxu1 %v2990_v12  ;;  %v2445_v12 = vunpack.c.h.bf16 %v2443_v32 }
  0x81   : > { %2773 = vmatpush3.bf16.msra.mxu0 %v2992_v13  ;;  %2678 = vmatprep.subr.bf16.mxu1 %v2993_v16 }
  0x82   : > { %2774 = vmatprep.subr.bf16.mxu0 %v2994_v24 }
  0x84   : > { %2679 = vmatpush3.bf16.msra.mxu1 %v2993_v16 }
  0x85   : > { %2775 = vmatpush3.bf16.msra.mxu0 %v2994_v24  ;;  %2808 = vmatprep.subr.bf16.mxu1 %v2997_v20 }
  0x86   : > { %2784 = vmatprep.subr.bf16.mxu0 %v2997_v20 }
  0x87   : > { %2681 = vmatmul.mubr.bf16.vlgmr.msra.gmra.mrb[0].mxu1 %v2270_v41  ;;  %v298_v41 = vld [vmem:[%s3112_s20 + $0x44] sm:$0xf] }
  0x88   : > { %2777 = vmatmul.mubr.bf16.vlgmr.msra.gmra.mrb[0].mxu0 %v2382_v30  ;;  %2816 = vmatpush3.bf16.msra.mxu1 %v2997_v20  ;;  %v2409_v30 = vcombine.low %v3401_v0, %v3426_v19  ;;  %v3008_v0 = vld [vmem:[%s3595_s1 + $0x238] sm:$0xff]  }
  0x89   : > { %2785 = vmatpush3.bf16.msra.mxu0 %v2997_v20  ;;  %2809 = vmatprep.subr.bf16.mxu1 %v2998_v61 }
  0x8a   : > { %2786 = vmatprep.subr.bf16.mxu0 %v2998_v61  ;;  %2684 = vmatprep.mubr.bf16.mxu1 %v2271_v10  ;;  %v1804_v10 = vshll.u32 %v298_v41, 16 }
  0x8b   : > { %2780 = vmatprep.mubr.bf16.mxu0 %v2383_v37  ;;  %v3005_v37 = vld [vmem:[%s3595_s1 + $0x220] sm:$0xff]  }
  0x8c   : > { %2817 = vmatpush3.bf16.msra.mxu1 %v2998_v61 }
  0x8d   : > { %2787 = vmatpush3.bf16.msra.mxu0 %v2998_v61  ;;  %2810 = vmatprep.subr.bf16.mxu1 %v3003_v36 }
  0x8e   : > { %2788 = vmatprep.subr.bf16.mxu0 %v3003_v36 }
  0x8f   : > { %2685 = vmatmul.mubr.bf16.gmra.mrb[4].mxu1 %v2272_v48  ;;  %v1806_v48 = vrot.slane %v1804_v10, 5 }
  0x90   : > { %2781 = vmatmul.mubr.bf16.gmra.mrb[4].mxu0 %v2384_v22  ;;  %2818 = vmatpush3.bf16.msra.mxu1 %v3003_v36 }
  0x91   : > { %2789 = vmatpush3.bf16.msra.mxu0 %v3003_v36  ;;  %2811 = vmatprep.subr.bf16.mxu1 %v3004_v27  ;;  %v1807_v19 = vsel %vm3233_vm2, %v1802_v56, %v1806_v48 }
  0x92   : > { %2790 = vmatprep.subr.bf16.mxu0 %v3004_v27  ;;  %2800 = vmatprep.mubr.bf16.mxu0 %v2409_v30  ;;  %v2412_v29 = vcombine.low %v3471_v18, %v1807_v19  ;;  %v2449_v18 = vunpack.c.h.bf16 %v2478_v51 }
  0x93   : > { %2804 = vmatprep.mubr.bf16.mxu1 %v2411_v28 }
  0x94   : > { %2819 = vmatpush3.bf16.msra.mxu1 %v3004_v27  ;;  %v1997_v20 = vmul.f32 1.4285715, %v2449_v18 }
  0x95   : > { %2791 = vmatpush3.bf16.msra.mxu0 %v3004_v27  ;;  %2812 = vmatprep.subr.bf16.mxu1 %v3005_v37 }
  0x96   : > { %2792 = vmatprep.subr.bf16.mxu0 %v3005_v37 }
  0x98   : > { %2820 = vmatpush3.bf16.msra.mxu1 %v3005_v37 }
  0x99   : > { %2793 = vmatpush3.bf16.msra.mxu0 %v3005_v37  ;;  %2813 = vmatprep.subr.bf16.mxu1 %v3006_v2 }
  0x9a   : > { %2794 = vmatprep.subr.bf16.mxu0 %v3006_v2 }
  0x9c   : > { %2821 = vmatpush3.bf16.msra.mxu1 %v3006_v2 }
  0x9d   : > { %2795 = vmatpush3.bf16.msra.mxu0 %v3006_v2  ;;  %2814 = vmatprep.subr.bf16.mxu1 %v3007_v44 }
  0x9e   : > { %2796 = vmatprep.subr.bf16.mxu0 %v3007_v44 }
  0xa0   : > { %2822 = vmatpush3.bf16.msra.mxu1 %v3007_v44 }
  0xa1   : > { %2797 = vmatpush3.bf16.msra.mxu0 %v3007_v44  ;;  %2815 = vmatprep.subr.bf16.mxu1 %v3008_v0 }
  0xa2   : > { %2798 = vmatprep.subr.bf16.mxu0 %v3008_v0 }
  0xa4   : > { %2823 = vmatpush3.bf16.msra.mxu1 %v3008_v0 }
  0xa5   : > { %2799 = vmatpush3.bf16.msra.mxu0 %v3008_v0 }
  0xa7   : > { %2805 = vmatmul.mubr.bf16.vlgmr.msra.gmra.mrb[8].mxu1 %v2412_v29 }
  0xa8   : > { %2801 = vmatmul.mubr.bf16.vlgmr.msra.gmra.mrb[0].mxu0 %v2410_v47 }
 0x15a   : > { %v2682_v31 = vpop.f32.mrb[0].mxu1 }
 0x15b   : > { %v1031_v21 = vpop.f32.mrb[1].mxu1 }
 0x15c   : > { %v2683_v40 = vpop.f32.mrb[2].mxu1 }
 0x15d   : > { %v1034_v5 = vpop.f32.mrb[3].mxu1 }
 0x162   : > { %v2686_v7 = vpop.f32.mrb[4].mxu1 }
 0x163   : > { %v2782_v50 = vpop.f32.mrb[4].mxu0  ;;  %v1047_v63 = vpop.f32.mrb[5].mxu1 }
 0x164   : > { %v2828_v6 = vadd.f32 %v2782_v50, %v2686_v7  ;;  %v1771_v43 = vpop.f32.mrb[5].mxu0  ;;  %v2687_v33 = vpop.f32.mrb[6].mxu1 }
 0x165   : > { %v2830_v58 = vadd.f32 %v1771_v43, %v1047_v63  ;;  %v2783_v11 = vpop.f32.mrb[6].mxu0  ;;  %v1050_v14 = vpop.f32.mrb[7].mxu1 }
 0x166   : > { %v2832_v52 = vadd.f32 %v2783_v11, %v2687_v33  ;;  %v1774_v45 = vpop.f32.mrb[7].mxu0 }
 0x167   : > { %v2834_v57 = vadd.f32 %v1774_v45, %v1050_v14 }
 0x17a   : > { %v2806_v39 = vpop.f32.mrb[8].mxu1 }
 0x17b   : > { %v2802_v60 = vpop.f32.mrb[0].mxu0  ;;  %v2829_v38 = vadd.f32 %v2828_v6, %v2806_v39  ;;  %v1932_v46 = vpop.f32.mrb[9].mxu1 }
 0x17c   : > { %v2824_v13 = vadd.f32 %v2802_v60, %v2682_v31  ;;  %v1916_v16 = vpop.f32.mrb[1].mxu0  ;;  %v2831_v24 = vadd.f32 %v2830_v58, %v1932_v46  ;;  %v2807_v61 = vpop.f32.mrb[10].mxu1 }
 0x17d   : > { %v1968_v36 = vadd.f32 %v2829_v38, %v2421_v1  ;;  %v2825_v22 = vadd.f32 %v1916_v16, %v1031_v21  ;;  %v2803_v27 = vpop.f32.mrb[2].mxu0  ;;  %v2833_v30 = vadd.f32 %v2832_v52, %v2807_v61  ;;  %v1935_v28 = vpop.f32.mrb[11].mxu1  ;;  %v1995_v21 = vmul.f32 1.4285715, %v2445_v12 }
 0x17e   : > { %v1964_v35 = vadd.f32 %v2824_v13, %v2421_v1  ;;  %v1966_v37 = vadd.f32 %v2831_v24, %v2421_v1  ;;  %v2826_v3 = vadd.f32 %v2803_v27, %v2683_v40  ;;  %v1919_v9 = vpop.f32.mrb[3].mxu0  ;;  %v2835_v41 = vadd.f32 %v2834_v57, %v1935_v28 }
 0x17f   : > { %v1976_v2 = vmax.f32 %v1968_v36, 0.0  ;;  %v1962_v8 = vadd.f32 %v2825_v22, %v2421_v1  ;;  %v1969_v10 = vadd.f32 %v2833_v30, %v2421_v1  ;;  %v2827_v44 = vadd.f32 %v1919_v9, %v1034_v5 }
 0x180   : > { %v1972_v56 = vmax.f32 %v1964_v35, 0.0  ;;  %v1974_v48 = vmax.f32 %v1966_v37, 0.0  ;;  %v1965_v0 = vadd.f32 %v2826_v3, %v2421_v1  ;;  %v1967_v19 = vadd.f32 %v2835_v41, %v2421_v1 }
 0x181   : > { %v1970_v29 = vmax.f32 %v1962_v8, 0.0  ;;  %v1977_v47 = vmax.f32 %v1969_v10, 0.0  ;;  %v1963_v31 = vadd.f32 %v2827_v44, %v2421_v1  ;;  %v2008_v63 = vmul.f32 %v2000_v54, %v1976_v2 }
 0x182   : > { %v1973_v7 = vmax.f32 %v1965_v0, 0.0  ;;  %v1975_v50 = vmax.f32 %v1967_v19, 0.0  ;;  %v2004_v43 = vmul.f32 %v1996_v42, %v1972_v56  ;;  %v2006_v33 = vmul.f32 %v1998_v49, %v1974_v48 }
 0x183   : > { %v2009_v6 = vmul.f32 %v2001_v25, %v1977_v47  ;;  %v1971_v40 = vmax.f32 %v1963_v31, 0.0  ;;  %v2002_v11 = vmul.f32 %v1994_v23, %v1970_v29 }
 0x184   : > { %v2005_v5 = vmul.f32 %v1997_v20, %v1973_v7  ;;  %v2007_v58 = vmul.f32 %v1999_v34, %v1975_v50 }
 0x185   : > { %v2476_v14 = vpack.c.bf16 %v2009_v6, %v2008_v63  ;;  %v2003_v52 = vmul.f32 %v1995_v21, %v1971_v40 }
 0x186   : > { %v2466_v45 = vpack.c.bf16 %v2005_v5, %v2004_v43  ;;  %v2471_v57 = vpack.c.bf16 %v2007_v58, %v2006_v33 }
 0x187   : > { %2483 = vst [vmem:[%s279_s26 + $0x18] sm:$0xff] %v2476_v14   ;;  %v2461_v51 = vpack.c.bf16 %v2003_v52, %v2002_v11 }
 0x188   : > { %2481 = vst [vmem:[%s279_s26 + $0x8] sm:$0xff] %v2466_v45   ;;  %2482 = vst [vmem:[%s279_s26 + $0x10] sm:$0xff] %v2471_v57  }
 0x189   : > { %2462 = vst [vmem:[%s279_s26] sm:$0xff] %v2461_v51  }
 0x18a PF: > { %s14_s17 = sadd.s32 1, %s3031_s17   ;;  %s3601_s15 = smov %s3027_s16 }
 0x18b   : > { %p11_p5 = scmp.ge.s32.totalorder %s14_s17, 4   ;;  %s3602_s16 = smov %s3604_s18 }
 0x18d   :  { %13 = sbr.rel (!%p11_p5) target bundleno = 2 (0x2), region = 83 }

// kernel: basic_block2_forward.5
= control target key start
LH: loop header
LB: loop body
LE: loop exit
PB: predicated region body
PF: predicated region fallthrough
CT: control target
= control target key end

     0   :  { %s3254_s24 = smov 0   ;;  %s3256_s25 = smov 0   ;;  %s3854_s0 = inlined_call_operand.vmem [shape: bf16[2,10,16,128], index: 0, kind: input, shape index: {}]   ;;  %s3855_s1 = inlined_call_operand.vmem [shape: bf16[9,128,128], index: 1, kind: input, shape index: {}]   ;;  %s3856_s2 = inlined_call_operand.vmem [shape: f32[1,128], index: 2, kind: input, shape index: {}]   ;;  %s3857_s3 = inlined_call_operand.vmem [shape: bf16[2,64,128], index: 3, kind: input, shape index: {}]   ;;  %s3858_s4 = inlined_call_operand.vmem [shape: bf16[2,64,128], index: 4, kind: input, shape index: {}]   ;;  %s3859_s5 = inlined_call_operand.vmem [shape: bf16[128,128], index: 5, kind: input, shape index: {}]   ;;  %s3860_s6 = inlined_call_operand.vmem [shape: f32[1,128], index: 6, kind: input, shape index: {}]   ;;  %s3861_s7 = inlined_call_operand.vmem [shape: f32[2,64,128], index: 7, kind: output, shape index: {}]  }
   0x1   :  { %s3258_s26 = smov 0  }
   0x2 LB: > { %s29_s27 = sadd.s32 1, %s3208_s25  ;;  %p2365_p0 = scmp.ge.s32.totalorder %s3212_s26, 1  ;;  %s3212_s26 = sphi %s3258_s26, %s17_s26   ;;  %s3208_s25 = sphi %s3256_s25, %s3867_s25   ;;  %s3204_s24 = sphi %s3254_s24, %s3866_s24  }
   0x3   : > { %p31_p1 = scmp.ge.s32.totalorder %s29_s27, 2  ;;  %p310_p2 = scmp.lt.s32.totalorder %s3212_s26, 3 }
   0x5   : > { %s3869_s27 = smov (%p31_p1, %s29_s27), 0  ;;  %p311_p3 = pnand %p2365_p0, %p310_p2 }
   0x6   : > { %v3097_v0 = vld [vmem:[%s3855_s1 + $0x40] sm:$0xff] (!%p311_p3)   ;;  %p372_p4 = scmp.lt.s32.totalorder (!%p311_p3), %s3204_s24, 1  ;;  %v3099_v2 = vld [vmem:[%s3855_s1 + $0x48] sm:$0xff] (!%p311_p3)   ;;  %v3101_v4 = vld [vmem:[%s3855_s1 + $0x50] sm:$0xff] (!%p311_p3)   ;;  %vm449_vm0 = vsmask.f32 (!%p311_p3), 3328 }
   0x7   : > { %314 = sbr.rel (%p311_p3) target bundleno = 405 (0x195), region = 48  ;;  %v3098_v1 = vld [vmem:[%s3855_s1 + $0x100] sm:$0xff] (!%p311_p3)   ;;  %2768 = vmatprep.subr.bf16.mxu1 (!%p311_p3), %v3097_v0  ;;  %v3100_v3 = vld [vmem:[%s3855_s1 + $0x108] sm:$0xff] (!%p311_p3)   ;;  %v3102_v5 = vld [vmem:[%s3855_s1 + $0x110] sm:$0xff] (!%p311_p3)   ;;  %vm450_vm1 = vsmask.f32 (!%p311_p3), 7440 }
   0x8   : > { %2864 = vmatprep.subr.bf16.mxu0 (!%p311_p3), %v3098_v1  ;;  %2769 = vmatpush3.bf16.msra.mxu1 (!%p311_p3), %v3097_v0  ;;  %v3103_v6 = vld [vmem:[%s3855_s1 + $0x58] sm:$0xff] (!%p311_p3)   ;;  %v3105_v8 = vld [vmem:[%s3855_s1 + $0x60] sm:$0xff] (!%p311_p3)   ;;  %v3107_v10 = vld [vmem:[%s3855_s1 + $0x68] sm:$0xff] (!%p311_p3)   ;;  %vm855_vm3 = vcmask (!%p311_p3), 1042432   ;;  %vm856_vm4 = vcmask (!%p311_p3), 1046532  }
   0x9   : > { %2865 = vmatpush3.bf16.msra.mxu0 (!%p311_p3), %v3098_v1  ;;  %2770 = vmatprep.subr.bf16.mxu1 (!%p311_p3), %v3099_v2  ;;  %v3104_v7 = vld [vmem:[%s3855_s1 + $0x118] sm:$0xff] (!%p311_p3)   ;;  %v3106_v9 = vld [vmem:[%s3855_s1 + $0x120] sm:$0xff] (!%p311_p3)   ;;  %v3108_v14 = vld [vmem:[%s3855_s1 + $0x128] sm:$0xff] (!%p311_p3)  }
   0xa   : > { %2866 = vmatprep.subr.bf16.mxu0 (!%p311_p3), %v3100_v3  ;;  %v3109_v22 = vld [vmem:[%s3855_s1 + $0x70] sm:$0xff] (!%p311_p3)   ;;  %v3111_v38 = vld [vmem:[%s3855_s1 + $0x78] sm:$0xff] (!%p311_p3)   ;;  %vm3361_vm2 = vmor (!%p311_p3), %vm449_vm0, %vm450_vm1 }
   0xb   : > { %v3110_v23 = vld [vmem:[%s3855_s1 + $0x130] sm:$0xff] (!%p311_p3)   ;;  %v3112_v48 = vld [vmem:[%s3855_s1 + $0x138] sm:$0xff] (!%p311_p3)   ;;  %v3113_v62 = vld [vmem:[%s3855_s1] sm:$0xff] (!%p311_p3)  }
   0xc   : > { %2771 = vmatpush3.bf16.msra.mxu1 (!%p311_p3), %v3099_v2  ;;  %vm3474_vm5 = vmor (!%p311_p3), %vm855_vm3, %vm856_vm4  ;;  %v3179_v39 = vld [vmem:[%s3859_s5 + $0x20] sm:$0xff] (!%p311_p3)  }
   0xd   : > { %2867 = vmatpush3.bf16.msra.mxu0 (!%p311_p3), %v3100_v3  ;;  %2772 = vmatprep.subr.bf16.mxu1 (!%p311_p3), %v3101_v4  ;;  %v3114_v3 = vld [vmem:[%s3855_s1 + $0x140] sm:$0xff] (!%p311_p3)  }
   0xe   : > { %s3871_s24 = smov (!%p372_p4, %s3204_s24), 1  ;;  %2868 = vmatprep.subr.bf16.mxu0 %v3102_v5 }
   0xf   : > { %s3072_s21 = smul.u32 80, %s3871_s24  ;;  %s2626_s16 = sshll.u32 %s3871_s24, 5 }
  0x10   : > { %2773 = vmatpush3.bf16.msra.mxu1 %v3101_v4  ;;  %s3661_s19 = scalar_lea.vmem %s3858_s4, %s2626_s16  ;;  %s391_s13 = scalar_lea.vmem %s3857_s3, %s2626_s16 }
  0x11   : > { %2869 = vmatpush3.bf16.msra.mxu0 %v3102_v5  ;;  %2774 = vmatprep.subr.bf16.mxu1 %v3103_v6  ;;  %s3308_s9 = scalar_lea.vmem %s3854_s0, %s3072_s21  ;;  %s2628_s18 = sshll.u32 %s3871_s24, 6 }
  0x12   : > { %2870 = vmatprep.subr.bf16.mxu0 %v3104_v7  ;;  %v3314_v11 = vld [vmem:[%s3308_s9] sm:$0xf]  ;;  %v3317_v12 = vld [vmem:[%s3308_s9 + $0x4] sm:$0xf]  ;;  %v3320_v13 = vld [vmem:[%s3308_s9 + $0x8] sm:$0xf]  ;;  %s3829_s21 = scalar_lea.vmem %s3861_s7, %s2628_s18 }
  0x13   : > { %v3326_v15 = vld [vmem:[%s3308_s9 + $0xc] sm:$0xf]  ;;  %v453_v16 = vshrl.u32 %v3314_v11, 16  ;;  %v456_v17 = vshll.u32 %v3314_v11, 16  ;;  %v462_v18 = vshll.u32 %v3317_v12, 16  ;;  %v467_v19 = vshrl.u32 %v3320_v13, 16 }
  0x14   : > { %2775 = vmatpush3.bf16.msra.mxu1 %v3103_v6  ;;  %v470_v20 = vshll.u32 %v3320_v13, 16  ;;  %v476_v21 = vshll.u32 %v3326_v15, 16  ;;  %v3341_v30 = vld [vmem:[%s3308_s9 + $0x10] sm:$0xf]  ;;  %v3344_v31 = vld [vmem:[%s3308_s9 + $0x14] sm:$0xf] }
  0x15   : > { %2871 = vmatpush3.bf16.msra.mxu0 %v3104_v7  ;;  %2776 = vmatprep.subr.bf16.mxu1 %v3105_v8  ;;  %v455_v24 = vrot.slane %v453_v16, 4  ;;  %v458_v25 = vrot.slane %v456_v17, 5  ;;  %v464_v26 = vrot.slane %v462_v18, 5  ;;  %v469_v27 = vrot.slane %v467_v19, 4  ;;  %v3347_v33 = vld [vmem:[%s3308_s9 + $0x18] sm:$0xf] }
  0x16   : > { %2872 = vmatprep.subr.bf16.mxu0 %v3106_v9  ;;  %v472_v28 = vrot.slane %v470_v20, 5  ;;  %v478_v29 = vrot.slane %v476_v21, 5  ;;  %v3350_v34 = vld [vmem:[%s3308_s9 + $0x1c] sm:$0xf]  ;;  %v481_v35 = vshrl.u32 %v3341_v30, 16  ;;  %v484_v36 = vshll.u32 %v3341_v30, 16 }
  0x17   : > { %v459_v32 = vor.u32 %v458_v25, %v455_v24  ;;  %v2465_v37 = vcombine.low %v3320_v13, %v3341_v30  ;;  %v490_v41 = vshll.u32 %v3344_v31, 16  ;;  %v495_v42 = vshrl.u32 %v3347_v33, 16  ;;  %v3373_v52 = vld [vmem:[%s3308_s9 + $0x20] sm:$0xf]  ;;  %v3378_v56 = vld [vmem:[%s3308_s9 + $0x24] sm:$0xf] }
  0x18   : > { %2777 = vmatpush3.bf16.msra.mxu1 %v3105_v8  ;;  %v473_v40 = vor.u32 %v472_v28, %v469_v27  ;;  %v498_v43 = vshll.u32 %v3347_v33, 16  ;;  %v483_v45 = vrot.slane %v481_v35, 4  ;;  %v486_v46 = vrot.slane %v484_v36, 5  ;;  %v3115_v17 = vld [vmem:[%s3855_s1 + $0x8] sm:$0xff]   ;;  %v3119_v35 = vld [vmem:[%s3855_s1 + $0x18] sm:$0xff]  }
  0x19   : > { %2873 = vmatpush3.bf16.msra.mxu0 %v3106_v9  ;;  %2778 = vmatprep.subr.bf16.mxu1 %v3107_v10  ;;  %v460_v44 = vrot.slane %v459_v32, 4  ;;  %v504_v47 = vshll.u32 %v3350_v34, 16  ;;  %v497_v50 = vrot.slane %v495_v42, 4  ;;  %v492_v55 = vrot.slane %v490_v41, 5  ;;  %v3116_v24 = vld [vmem:[%s3855_s1 + $0x148] sm:$0xff]   ;;  %v3118_v32 = vld [vmem:[%s3855_s1 + $0x150] sm:$0xff]  }
  0x1a   : > { %2874 = vmatprep.subr.bf16.mxu0 %v3108_v14  ;;  %v474_v49 = vrot.slane %v473_v40, 4  ;;  %v500_v51 = vrot.slane %v498_v43, 5  ;;  %v487_v54 = vor.u32 %v486_v46, %v483_v45  ;;  %v509_v60 = vshrl.u32 %v3373_v52, 16  ;;  %v3414_v25 = vld [vmem:[%s3308_s9 + $0x28] sm:$0xf] }
  0x1b   : > { %v465_v53 = vsel %vm3361_vm2, %v460_v44, %v464_v26  ;;  %v506_v59 = vrot.slane %v504_v47, 5  ;;  %v512_v0 = vshll.u32 %v3373_v52, 16  ;;  %v518_v1 = vshll.u32 %v3378_v56, 16  ;;  %v3418_v27 = vld [vmem:[%s3308_s9 + $0x2c] sm:$0xf] }
  0x1c   : > { %2779 = vmatpush3.bf16.msra.mxu1 %v3107_v10  ;;  %v479_v57 = vsel %vm3361_vm2, %v474_v49, %v478_v29  ;;  %v501_v58 = vor.u32 %v500_v51, %v497_v50  ;;  %v488_v63 = vrot.slane %v487_v54, 4  ;;  %v511_v4 = vrot.slane %v509_v60, 4  ;;  %v3433_v42 = vld [vmem:[%s3308_s9 + $0x34] sm:$0xf]  ;;  %v3120_v54 = vld [vmem:[%s3855_s1 + $0x158] sm:$0xff]  }
  0x1d   : > { %2875 = vmatpush3.bf16.msra.mxu0 %v3108_v14  ;;  %2780 = vmatprep.subr.bf16.mxu1 %v3109_v22  ;;  %v2389_v61 = vcombine.low %v465_v53, %v479_v57  ;;  %v514_v6 = vrot.slane %v512_v0, 5  ;;  %v2466_v7 = vcombine.low %v3347_v33, %v3373_v52  ;;  %v520_v16 = vrot.slane %v518_v1, 5  ;;  %v3442_v53 = vld [vmem:[%s3308_s9 + $0x38] sm:$0xf]  ;;  %v3457_v0 = vld [vmem:[%s3308_s9 + $0x40] sm:$0xf] }
  0x1e   : > { %2876 = vmatprep.subr.bf16.mxu0 %v3110_v23  ;;  %v502_v2 = vrot.slane %v501_v58, 4  ;;  %v493_v5 = vsel %vm3361_vm2, %v488_v63, %v492_v55  ;;  %v864_v19 = vrot.slane %v3326_v15, 5  ;;  %v868_v20 = vrot.slane %v3344_v31, 5  ;;  %v3121_v55 = vld [vmem:[%s3855_s1 + $0x20] sm:$0xff]   ;;  %v3451_v58 = vld [vmem:[%s3308_s9 + $0x3c] sm:$0xf] }
  0x1f   : > { %2784 = vmatprep.mubr.bf16.mxu1 %v2389_v61  ;;  %v2493_v9 = vcombine.low %v479_v57, %v493_v5  ;;  %v515_v14 = vor.u32 %v514_v6, %v511_v4  ;;  %v2414_v26 = vrot.slane %v3320_v13, 9  ;;  %v523_v28 = vshrl.u32 %v3414_v25, 16  ;;  %v3460_v1 = vld [vmem:[%s3308_s9 + $0x44] sm:$0xf]  ;;  %v3124_v15 = vld [vmem:[%s3855_s1 + $0x168] sm:$0xff]  }
  0x20   : > { %2781 = vmatpush3.bf16.msra.mxu1 %v3109_v22  ;;  %v507_v8 = vsel %vm3361_vm2, %v502_v2, %v506_v59  ;;  %v3117_v22 = vld [vmem:[%s3855_s1 + $0x10] sm:$0xff]   ;;  %v526_v29 = vshll.u32 %v3414_v25, 16  ;;  %v532_v36 = vshll.u32 %v3418_v27, 16  ;;  %v546_v45 = vshll.u32 %v3433_v42, 16 }
  0x21   : > { %2877 = vmatpush3.bf16.msra.mxu0 %v3110_v23  ;;  %2782 = vmatprep.subr.bf16.mxu1 %v3111_v38  ;;  %v3397_v10 = vcombine.low %v493_v5, %v507_v8  ;;  %v516_v18 = vrot.slane %v515_v14, 4  ;;  %v525_v40 = vrot.slane %v523_v28, 4  ;;  %v2415_v46 = vrot.slane %v3341_v30, 9  ;;  %v3123_v28 = vld [vmem:[%s3855_s1 + $0x28] sm:$0xff]  }
  0x22   : > { %2878 = vmatprep.subr.bf16.mxu0 %v3112_v48  ;;  %2880 = vmatprep.mubr.bf16.mxu0 %v2493_v9  ;;  %v528_v41 = vrot.slane %v526_v29, 5  ;;  %v534_v49 = vrot.slane %v532_v36, 5  ;;  %v548_v57 = vrot.slane %v546_v45, 5  ;;  %v551_v59 = vshrl.u32 %v3442_v53, 16 }
  0x23   : > { %v521_v21 = vsel %vm3361_vm2, %v516_v18, %v520_v16  ;;  %v554_v60 = vshll.u32 %v3442_v53, 16  ;;  %v560_v63 = vshll.u32 %v3451_v58, 16  ;;  %v1193_v4 = vshrl.u32 %v3457_v0, 16  ;;  %v3122_v16 = vld [vmem:[%s3855_s1 + $0x160] sm:$0xff]  }
  0x24   : > { %2783 = vmatpush3.bf16.msra.mxu1 %v3111_v38  ;;  %v2494_v23 = vcombine.low %v507_v8, %v521_v21  ;;  %v3430_v38 = vld [vmem:[%s3308_s9 + $0x30] sm:$0xf]  ;;  %v553_v2 = vrot.slane %v551_v59, 4  ;;  %v1196_v5 = vshll.u32 %v3457_v0, 16  ;;  %v1202_v14 = vshll.u32 %v3460_v1, 16  ;;  %v3130_v59 = vld [vmem:[%s3855_s1 + $0x80] sm:$0xff]  }
  0x25   : > { %2879 = vmatpush3.bf16.msra.mxu0 %v3112_v48  ;;  %2792 = vmatprep.subr.bf16.mxu1 %v3113_v62  ;;  %v537_v43 = vshrl.u32 %v3430_v38, 16  ;;  %v540_v44 = vshll.u32 %v3430_v38, 16  ;;  %v2467_v47 = vcombine.low %v3414_v25, %v3430_v38  ;;  %v529_v48 = vor.u32 %v528_v41, %v525_v40 }
  0x26   : > { %2888 = vmatprep.subr.bf16.mxu0 %v3114_v3  ;;  %v562_v9 = vrot.slane %v560_v63, 5  ;;  %v1204_v41 = vrot.slane %v1202_v14, 5  ;;  %v3496_v45 = vsel %vm3474_vm5, %v2414_v26, %v864_v19  ;;  %v3127_v26 = vld [vmem:[%s3855_s1 + $0x38] sm:$0xff]   ;;  %v884_v63 = vrot.slane %v3433_v42, 5  ;;  %v3133_v42 = vld [vmem:[%s3855_s1 + $0x88] sm:$0xff]  }
  0x27   : > { %2785 = vmatmul.mubr.bf16.vlgmr.msra.gmra.mrb[0].mxu1 %v3397_v10  ;;  %v539_v50 = vrot.slane %v537_v43, 4  ;;  %v542_v51 = vrot.slane %v540_v44, 5  ;;  %v530_v61 = vrot.slane %v529_v48, 4  ;;  %v3502_v48 = vsel %vm3474_vm5, %v2415_v46, %v868_v20  ;;  %v3126_v46 = vld [vmem:[%s3855_s1 + $0x170] sm:$0xff]  }
  0x28   : > { %2793 = vmatpush3.bf16.msra.mxu1 %v3113_v62  ;;  %2881 = vmatmul.mubr.bf16.vlgmr.msra.gmra.mrb[0].mxu0 %v2494_v23  ;;  %v1198_v23 = vrot.slane %v1196_v5, 5  ;;  %v2522_v20 = vcombine.low %v3496_v45, %v3502_v48  ;;  %v3131_v5 = vld [vmem:[%s3855_s1 + $0x180] sm:$0xff]   ;;  %v2420_v14 = vrot.slane %v3442_v53, 9 }
  0x29   : > { %2794 = vmatprep.subr.bf16.mxu1 %v3115_v17  ;;  %2889 = vmatpush3.bf16.msra.mxu0 %v3114_v3  ;;  %v543_v62 = vor.u32 %v542_v51, %v539_v50  ;;  %v556_v3 = vrot.slane %v554_v60, 5  ;;  %v535_v6 = vsel %vm3361_vm2, %v530_v61, %v534_v49  ;;  %v3125_v49 = vld [vmem:[%s3855_s1 + $0x30] sm:$0xff]   ;;  %v872_v51 = vrot.slane %v3350_v34, 5 }
  0x2a   : > { %2890 = vmatprep.subr.bf16.mxu0 %v3116_v24  ;;  %v2417_v60 = vrot.slane %v3373_v52, 9  ;;  %v2418_v34 = vrot.slane %v3414_v25, 9  ;;  %v2402_v61 = vcombine.low %v3341_v30, %v3347_v33  ;;  %v3158_v30 = vld [vmem:[%s3855_s1 + $0x1e0] sm:$0xff]  }
  0x2b   : > { %v544_v8 = vrot.slane %v543_v62, 4  ;;  %v557_v18 = vor.u32 %v556_v3, %v553_v2  ;;  %v2419_v62 = vrot.slane %v3430_v38, 9  ;;  %v860_v2 = vrot.slane %v3317_v12, 5 }
  0x2c   : > { %2795 = vmatpush3.bf16.msra.mxu1 %v3115_v17  ;;  %v3470_v17 = vcombine.low %v521_v21, %v535_v6  ;;  %v2468_v21 = vcombine.low %v3442_v53, %v3457_v0  ;;  %v3545_v3 = vcombine.low %v3373_v52, %v3414_v25  ;;  %v2413_v12 = vrot.slane %v3314_v11, 9  ;;  %v3177_v52 = vld [vmem:[%s3859_s5 + $0x18] sm:$0xff]   ;;  %v3174_v25 = vld [vmem:[%s3855_s1 + $0x210] sm:$0xff]  }
  0x2d   : > { %2796 = vmatprep.subr.bf16.mxu1 %v3117_v22  ;;  %2891 = vmatpush3.bf16.msra.mxu0 %v3116_v24  ;;  %v549_v29 = vsel %vm3361_vm2, %v544_v8, %v548_v57  ;;  %v558_v36 = vrot.slane %v557_v18, 4  ;;  %v2416_v57 = vrot.slane %v3347_v33, 9  ;;  %v2505_v18 = vrot.slane %v3457_v0, 9  ;;  %v3153_v24 = vld [vmem:[%s3855_s1 + $0xd0] sm:$0xff]   ;;  %v3186_v33 = vld [vmem:[%s3661_s19] sm:$0xff]  }
  0x2e   : > { %2892 = vmatprep.subr.bf16.mxu0 %v3118_v32  ;;  %2788 = vmatprep.mubr.bf16.mxu1 %v3470_v17 }
  0x2f   : > { %v563_v43 = vsel %vm3361_vm2, %v558_v36, %v562_v9  ;;  %v3571_v9 = vsel %vm3474_vm5, %v2419_v62, %v884_v63  ;;  %v3152_v63 = vld [vmem:[%s3855_s1 + $0x1c8] sm:$0xff]  }
  0x30   : > { %2797 = vmatpush3.bf16.msra.mxu1 %v3117_v22  ;;  %v1195_v22 = vrot.slane %v1193_v4, 4  ;;  %v3507_v50 = vcombine.low %v549_v29, %v563_v43  ;;  %v3549_v4 = vsel %vm3474_vm5, %v2416_v57, %v872_v51  ;;  %v3148_v51 = vld [vmem:[%s3855_s1 + $0x1b8] sm:$0xff]   ;;  %v3645_v57 = vld [vmem:[%s3308_s9 + $0x4c] sm:$0xf] }
  0x31   : > { %2798 = vmatprep.subr.bf16.mxu1 %v3119_v35  ;;  %2893 = vmatpush3.bf16.msra.mxu0 %v3118_v32  ;;  %v2401_v32 = vcombine.low %v3314_v11, %v3320_v13  ;;  %v3159_v13 = vld [vmem:[%s3855_s1 + $0xe8] sm:$0xff]  }
  0x32   : > { %2894 = vmatprep.subr.bf16.mxu0 %v3120_v54  ;;  %v1199_v40 = vor.u32 %v1198_v23, %v1195_v22  ;;  %2789 = vmatmul.mubr.bf16.gmra.mrb[4].mxu1 %v3507_v50  ;;  %v1356_v22 = vrot.slane %v3460_v1, 5  ;;  %v861_v23 = vsel %vm3474_vm5, %v2413_v12, %v860_v2  ;;  %v3137_v1 = vld [vmem:[%s3855_s1 + $0x98] sm:$0xff]  }
  0x33   : > { %2808 = vmatprep.mubr.bf16.mxu1 %v2401_v32  ;;  %v3156_v12 = vld [vmem:[%s3855_s1 + $0x1d8] sm:$0xff]  }
  0x34   : > { %2799 = vmatpush3.bf16.msra.mxu1 %v3119_v35  ;;  %v2495_v35 = vcombine.low %v535_v6, %v549_v29  ;;  %v1200_v44 = vrot.slane %v1199_v40, 4  ;;  %v3135_v6 = vld [vmem:[%s3855_s1 + $0x90] sm:$0xff]   ;;  %v3601_v40 = vsel %vm3474_vm5, %v2505_v18, %v1356_v22  ;;  %v3165_v18 = vld [vmem:[%s3855_s1 + $0x1f8] sm:$0xff]   ;;  %v3172_v22 = vld [vmem:[%s3859_s5 + $0x8] sm:$0xff]  }
  0x35   : > { %2800 = vmatprep.subr.bf16.mxu1 %v3121_v55  ;;  %2895 = vmatpush3.bf16.msra.mxu0 %v3120_v54  ;;  %v876_v54 = vrot.slane %v3378_v56, 5  ;;  %v880_v56 = vrot.slane %v3418_v27, 5 }
  0x36   : > { %2884 = vmatprep.mubr.bf16.mxu0 %v2495_v35  ;;  %2896 = vmatprep.subr.bf16.mxu0 %v3122_v16  ;;  %v3514_v31 = vsel %vm3361_vm2, %v1200_v44, %v1204_v41  ;;  %v2437_v35 = vcombine.low %v861_v23, %v3496_v45  ;;  %v3136_v41 = vld [vmem:[%s3855_s1 + $0x190] sm:$0xff]   ;;  %v3138_v44 = vld [vmem:[%s3855_s1 + $0x198] sm:$0xff]   ;;  %v3141_v45 = vld [vmem:[%s3855_s1 + $0xa8] sm:$0xff]  }
  0x37   : > { %v2496_v19 = vcombine.low %v563_v43, %v3514_v31  ;;  %v3553_v27 = vsel %vm3474_vm5, %v2417_v60, %v876_v54  ;;  %v3567_v8 = vsel %vm3474_vm5, %v2418_v34, %v880_v56  ;;  %v3139_v43 = vld [vmem:[%s3855_s1 + $0xa0] sm:$0xff]   ;;  %v1805_v60 = vrot.slane %v3645_v57, 5 }
  0x38   : > { %2801 = vmatpush3.bf16.msra.mxu1 %v3121_v55  ;;  %v3128_v55 = vld [vmem:[%s3855_s1 + $0x178] sm:$0xff]   ;;  %v2523_v11 = vcombine.low %v3549_v4, %v3553_v27  ;;  %v2524_v29 = vcombine.low %v3567_v8, %v3571_v9  ;;  %v3149_v54 = vld [vmem:[%s3855_s1 + $0xc0] sm:$0xff]   ;;  %v3654_v34 = vcombine.low %v3553_v27, %v3567_v8  ;;  %v3154_v27 = vld [vmem:[%s3855_s1 + $0x1d0] sm:$0xff]  }
  0x39   : > { %2802 = vmatprep.subr.bf16.mxu1 %v3123_v28  ;;  %2897 = vmatpush3.bf16.msra.mxu0 %v3122_v16  ;;  %v888_v16 = vrot.slane %v3451_v58, 5  ;;  %v3589_v58 = vcombine.low %v3430_v38, %v3442_v53  ;;  %v3181_v53 = vld [vmem:[%s3859_s5 + $0x28] sm:$0xff]  }
  0x3a   : > { %2898 = vmatprep.subr.bf16.mxu0 %v3124_v15  ;;  %2885 = vmatmul.mubr.bf16.gmra.mrb[4].mxu0 %v2496_v19  ;;  %v3142_v19 = vld [vmem:[%s3855_s1 + $0x1a8] sm:$0xff]  }
  0x3b   : > { %2904 = vmatprep.mubr.bf16.mxu0 %v2522_v20  ;;  %v3597_v36 = vsel %vm3474_vm5, %v2420_v14, %v888_v16  ;;  %v3147_v20 = vld [vmem:[%s3855_s1 + $0xb8] sm:$0xff]  }
  0x3c   : > { %2803 = vmatpush3.bf16.msra.mxu1 %v3123_v28  ;;  %v3134_v28 = vld [vmem:[%s3855_s1 + $0x188] sm:$0xff]   ;;  %v2525_v32 = vcombine.low %v3597_v36, %v3601_v40  ;;  %v3685_v2 = vcombine.low %v3571_v9, %v3597_v36  ;;  %v3162_v9 = vld [vmem:[%s3855_s1 + $0x1f0] sm:$0xff]  }
  0x3d   : > { %2804 = vmatprep.subr.bf16.mxu1 %v3125_v49  ;;  %2899 = vmatpush3.bf16.msra.mxu0 %v3124_v15  ;;  %v3144_v15 = vld [vmem:[%s3855_s1 + $0xb0] sm:$0xff]   ;;  %v3170_v36 = vld [vmem:[%s3855_s1 + $0x208] sm:$0xff]  }
  0x3e   : > { %2900 = vmatprep.subr.bf16.mxu0 %v3126_v46 }
  0x40   : > { %2805 = vmatpush3.bf16.msra.mxu1 %v3125_v49  ;;  %v3140_v49 = vld [vmem:[%s3855_s1 + $0x1a0] sm:$0xff]  }
  0x41   : > { %2806 = vmatprep.subr.bf16.mxu1 %v3127_v26  ;;  %2901 = vmatpush3.bf16.msra.mxu0 %v3126_v46  ;;  %v3634_v46 = vld [vmem:[%s3308_s9 + $0x48] sm:$0xf] }
  0x42   : > { %2902 = vmatprep.subr.bf16.mxu0 %v3128_v55  ;;  %v1651_v8 = vshll.u32 %v3634_v46, 16 }
  0x44   : > { %2807 = vmatpush3.bf16.msra.mxu1 %v3127_v26  ;;  %v3145_v26 = vld [vmem:[%s3855_s1 + $0x1b0] sm:$0xff]   ;;  %v1653_v16 = vrot.slane %v1651_v8, 5 }
  0x45   : > { %2816 = vmatprep.subr.bf16.mxu1 %v3130_v59  ;;  %2903 = vmatpush3.bf16.msra.mxu0 %v3128_v55  ;;  %v2584_v55 = vrot.slane %v3634_v46, 9 }
  0x46   : > { %2912 = vmatprep.subr.bf16.mxu0 %v3131_v5 }
  0x47   : > { %2809 = vmatmul.mubr.bf16.vlgmr.msra.gmra.mrb[0].mxu1 %v2402_v61  ;;  %v3668_v56 = vsel %vm3474_vm5, %v2584_v55, %v1805_v60 }
  0x48   : > { %2817 = vmatpush3.bf16.msra.mxu1 %v3130_v59  ;;  %2812 = vmatprep.mubr.bf16.mxu1 %v3545_v3  ;;  %v3649_v59 = vcombine.low %v3502_v48, %v3549_v4  ;;  %v3151_v48 = vld [vmem:[%s3855_s1 + $0xc8] sm:$0xff]   ;;  %v2601_v62 = vcombine.low %v3601_v40, %v3668_v56  ;;  %v3155_v4 = vld [vmem:[%s3855_s1 + $0xd8] sm:$0xff]  }
  0x49   : > { %2818 = vmatprep.subr.bf16.mxu1 %v3133_v42  ;;  %2905 = vmatmul.mubr.bf16.vlgmr.msra.gmra.mrb[0].mxu0 %v2523_v11  ;;  %v3169_v11 = vld [vmem:[%s3859_s5] sm:$0xff]  }
  0x4a   : > { %2913 = vmatpush3.bf16.msra.mxu0 %v3131_v5  ;;  %2908 = vmatprep.mubr.bf16.mxu0 %v2524_v29  ;;  %v3160_v5 = vld [vmem:[%s3855_s1 + $0x1e8] sm:$0xff]   ;;  %v3168_v29 = vld [vmem:[%s3855_s1 + $0x200] sm:$0xff]  }
  0x4b   : > { %2914 = vmatprep.subr.bf16.mxu0 %v3134_v28 }
  0x4c   : > { %2819 = vmatpush3.bf16.msra.mxu1 %v3133_v42  ;;  %v3157_v42 = vld [vmem:[%s3855_s1 + $0xe0] sm:$0xff]  }
  0x4d   : > { %2820 = vmatprep.subr.bf16.mxu1 %v3135_v6 }
  0x4e   : > { %2915 = vmatpush3.bf16.msra.mxu0 %v3134_v28  ;;  %v1657_v28 = vshll.u32 %v3645_v57, 16  ;;  %v2630_v57 = vld [vmem:[%s391_s13] sm:$0xff]  }
  0x4f   : > { %2813 = vmatmul.mubr.bf16.gmra.mrb[4].mxu1 %v3589_v58  ;;  %2916 = vmatprep.subr.bf16.mxu0 %v3136_v41 }
  0x50   : > { %2821 = vmatpush3.bf16.msra.mxu1 %v3135_v6  ;;  %2832 = vmatprep.mubr.bf16.mxu1 %v2437_v35  ;;  %v1648_v6 = vshrl.u32 %v3634_v46, 16 }
  0x51   : > { %2822 = vmatprep.subr.bf16.mxu1 %v3137_v1  ;;  %2909 = vmatmul.mubr.bf16.gmra.mrb[4].mxu0 %v2525_v32  ;;  %v3187_v32 = vld [vmem:[%s3661_s19 + $0x8] sm:$0xff]  }
  0x52   : > { %2917 = vmatpush3.bf16.msra.mxu0 %v3136_v41  ;;  %2928 = vmatprep.mubr.bf16.mxu0 %v2402_v61  ;;  %v3150_v61 = vld [vmem:[%s3855_s1 + $0x1c0] sm:$0xff]   ;;  %v1650_v14 = vrot.slane %v1648_v6, 4  ;;  %v3184_v41 = vld [vmem:[%s3855_s1 + $0x238] sm:$0xff]  }
  0x53   : > { %2918 = vmatprep.subr.bf16.mxu0 %v3138_v44 }
  0x54   : > { %2823 = vmatpush3.bf16.msra.mxu1 %v3137_v1  ;;  %v1654_v23 = vor.u32 %v1653_v16, %v1650_v14  ;;  %v1659_v1 = vrot.slane %v1657_v28, 5 }
  0x55   : > { %2824 = vmatprep.subr.bf16.mxu1 %v3139_v43 }
  0x56   : > { %2919 = vmatpush3.bf16.msra.mxu0 %v3138_v44  ;;  %v1655_v35 = vrot.slane %v1654_v23, 4  ;;  %v3189_v44 = vld [vmem:[%s3661_s19 + $0x18] sm:$0xff]  }
  0x57   : > { %2920 = vmatprep.subr.bf16.mxu0 %v3140_v49 }
  0x58   : > { %2825 = vmatpush3.bf16.msra.mxu1 %v3139_v43  ;;  %v3188_v43 = vld [vmem:[%s3661_s19 + $0x10] sm:$0xff]  }
  0x59   : > { %2826 = vmatprep.subr.bf16.mxu1 %v3141_v45 }
  0x5a   : > { %2921 = vmatpush3.bf16.msra.mxu0 %v3140_v49 }
  0x5b   : > { %2922 = vmatprep.subr.bf16.mxu0 %v3142_v19 }
  0x5c   : > { %2827 = vmatpush3.bf16.msra.mxu1 %v3141_v45 }
  0x5d   : > { %2828 = vmatprep.subr.bf16.mxu1 %v3144_v15 }
  0x5e   : > { %2923 = vmatpush3.bf16.msra.mxu0 %v3142_v19 }
  0x5f   : > { %2924 = vmatprep.subr.bf16.mxu0 %v3145_v26 }
  0x60   : > { %2829 = vmatpush3.bf16.msra.mxu1 %v3144_v15 }
  0x61   : > { %2830 = vmatprep.subr.bf16.mxu1 %v3147_v20 }
  0x62   : > { %2925 = vmatpush3.bf16.msra.mxu0 %v3145_v26 }
  0x63   : > { %2926 = vmatprep.subr.bf16.mxu0 %v3148_v51 }
  0x64   : > { %2831 = vmatpush3.bf16.msra.mxu1 %v3147_v20 }
  0x65   : > { %2840 = vmatprep.subr.bf16.mxu1 %v3149_v54 }
  0x66   : > { %2927 = vmatpush3.bf16.msra.mxu0 %v3148_v51 }
  0x67   : > { %2833 = vmatmul.mubr.bf16.vlgmr.msra.gmra.mrb[0].mxu1 %v3649_v59  ;;  %2936 = vmatprep.subr.bf16.mxu0 %v3150_v61 }
  0x68   : > { %2841 = vmatpush3.bf16.msra.mxu1 %v3149_v54  ;;  %2836 = vmatprep.mubr.bf16.mxu1 %v3654_v34  ;;  %v2645_v54 = vld [vmem:[%s391_s13 + $0x8] sm:$0xff]  }
  0x69   : > { %2842 = vmatprep.subr.bf16.mxu1 %v3151_v48  ;;  %2929 = vmatmul.mubr.bf16.vlgmr.msra.gmra.mrb[0].mxu0 %v3545_v3  ;;  %v2550_v3 = vcombine.low %v3457_v0, %v3634_v46  ;;  %v3178_v0 = vld [vmem:[%s3855_s1 + $0x220] sm:$0xff]   ;;  %v2636_v56 = vunpack.c.h.bf16 %v2645_v54 }
  0x6a   : > { %2937 = vmatpush3.bf16.msra.mxu0 %v3150_v61  ;;  %2932 = vmatprep.mubr.bf16.mxu0 %v3589_v58  ;;  %v3175_v58 = vld [vmem:[%s3859_s5 + $0x10] sm:$0xff]   ;;  %v2632_v61 = vunpack.c.h.bf16 %v2630_v57 }
  0x6b   : > { %2938 = vmatprep.subr.bf16.mxu0 %v3152_v63  ;;  %v1982_v6 = vmul.f32 1.4285715, %v2636_v56 }
  0x6c   : > { %2843 = vmatpush3.bf16.msra.mxu1 %v3151_v48  ;;  %v1980_v8 = vmul.f32 1.4285715, %v2632_v61 }
  0x6d   : > { %2844 = vmatprep.subr.bf16.mxu1 %v3153_v24 }
  0x6e   : > { %2939 = vmatpush3.bf16.msra.mxu0 %v3152_v63 }
  0x6f   : > { %2837 = vmatmul.mubr.bf16.gmra.mrb[4].mxu1 %v3685_v2  ;;  %2940 = vmatprep.subr.bf16.mxu0 %v3154_v27 }
  0x70   : > { %2845 = vmatpush3.bf16.msra.mxu1 %v3153_v24  ;;  %2856 = vmatprep.mubr.bf16.mxu1 %v2465_v37  ;;  %v3161_v37 = vld [vmem:[%s3855_s1 + $0xf0] sm:$0xff]   ;;  %v3816_v24 = vld [vmem:[%s3856_s2] ss:$0 sm:$0xff] }
  0x71   : > { %2846 = vmatprep.subr.bf16.mxu1 %v3155_v4  ;;  %2933 = vmatmul.mubr.bf16.gmra.mrb[4].mxu0 %v2550_v3  ;;  %v2646_v3 = vld [vmem:[%s391_s13 + $0x10] sm:$0xff]  }
  0x72   : > { %2941 = vmatpush3.bf16.msra.mxu0 %v3154_v27  ;;  %2952 = vmatprep.mubr.bf16.mxu0 %v3397_v10  ;;  %v3164_v10 = vld [vmem:[%s3855_s1 + $0xf8] sm:$0xff]   ;;  %v2639_v16 = vunpack.c.l.bf16 %v2646_v3 }
  0x73   : > { %2942 = vmatprep.subr.bf16.mxu0 %v3156_v12  ;;  %v2647_v27 = vld [vmem:[%s391_s13 + $0x18] sm:$0xff]  }
  0x74   : > { %2847 = vmatpush3.bf16.msra.mxu1 %v3155_v4  ;;  %v2643_v14 = vunpack.c.l.bf16 %v2647_v27  ;;  %v2644_v28 = vunpack.c.h.bf16 %v2647_v27 }
  0x75   : > { %2848 = vmatprep.subr.bf16.mxu1 %v3157_v42 }
  0x76   : > { %2943 = vmatpush3.bf16.msra.mxu0 %v3156_v12 }
  0x77   : > { %2944 = vmatprep.subr.bf16.mxu0 %v3158_v30 }
  0x78   : > { %2849 = vmatpush3.bf16.msra.mxu1 %v3157_v42 }
  0x79   : > { %2850 = vmatprep.subr.bf16.mxu1 %v3159_v13 }
  0x7a   : > { %2945 = vmatpush3.bf16.msra.mxu0 %v3158_v30 }
  0x7b   : > { %2946 = vmatprep.subr.bf16.mxu0 %v3160_v5 }
  0x7c   : > { %2851 = vmatpush3.bf16.msra.mxu1 %v3159_v13 }
  0x7d   : > { %2852 = vmatprep.subr.bf16.mxu1 %v3161_v37 }
  0x7e   : > { %2947 = vmatpush3.bf16.msra.mxu0 %v3160_v5 }
  0x7f   : > { %2948 = vmatprep.subr.bf16.mxu0 %v3162_v9 }
  0x80   : > { %2853 = vmatpush3.bf16.msra.mxu1 %v3161_v37 }
  0x81   : > { %2854 = vmatprep.subr.bf16.mxu1 %v3164_v10 }
  0x82   : > { %2949 = vmatpush3.bf16.msra.mxu0 %v3162_v9 }
  0x83   : > { %2950 = vmatprep.subr.bf16.mxu0 %v3165_v18 }
  0x84   : > { %2855 = vmatpush3.bf16.msra.mxu1 %v3164_v10 }
  0x85   : > { %2984 = vmatprep.subr.bf16.mxu1 %v3169_v11 }
  0x86   : > { %2951 = vmatpush3.bf16.msra.mxu0 %v3165_v18 }
  0x87   : > { %2857 = vmatmul.mubr.bf16.vlgmr.msra.gmra.mrb[0].mxu1 %v2466_v7  ;;  %2960 = vmatprep.subr.bf16.mxu0 %v3168_v29  ;;  %v1660_v7 = vsel %vm3361_vm2, %v1655_v35, %v1659_v1  ;;  %v2623_v35 = vld [vmem:[%s3860_s6] ss:$0 sm:$0xff] }
  0x88   : > { %2985 = vmatpush3.bf16.msra.mxu1 %v3169_v11  ;;  %2860 = vmatprep.mubr.bf16.mxu1 %v2467_v47  ;;  %v2575_v38 = vcombine.low %v3514_v31, %v1660_v7  ;;  %v3176_v47 = vld [vmem:[%s3855_s1 + $0x218] sm:$0xff]   ;;  %v3182_v31 = vld [vmem:[%s3855_s1 + $0x230] sm:$0xff]  }
  0x89   : > { %2986 = vmatprep.subr.bf16.mxu1 %v3172_v22  ;;  %2953 = vmatmul.mubr.bf16.vlgmr.msra.gmra.mrb[0].mxu0 %v3470_v17  ;;  %v3183_v17 = vld [vmem:[%s3859_s5 + $0x30] sm:$0xff]  }
  0x8a   : > { %2961 = vmatpush3.bf16.msra.mxu0 %v3168_v29  ;;  %2956 = vmatprep.mubr.bf16.mxu0 %v3507_v50  ;;  %v3185_v50 = vld [vmem:[%s3859_s5 + $0x38] sm:$0xff]  }
  0x8b   : > { %2962 = vmatprep.subr.bf16.mxu0 %v3170_v36 }
  0x8c   : > { %2987 = vmatpush3.bf16.msra.mxu1 %v3172_v22 }
  0x8d   : > { %2988 = vmatprep.subr.bf16.mxu1 %v3175_v58 }
  0x8e   : > { %2963 = vmatpush3.bf16.msra.mxu0 %v3170_v36  ;;  %v2640_v36 = vunpack.c.h.bf16 %v2646_v3 }
  0x8f   : > { %2861 = vmatmul.mubr.bf16.gmra.mrb[4].mxu1 %v2468_v21  ;;  %2964 = vmatprep.subr.bf16.mxu0 %v3174_v25  ;;  %v3180_v21 = vld [vmem:[%s3855_s1 + $0x228] sm:$0xff]  }
  0x90   : > { %2989 = vmatpush3.bf16.msra.mxu1 %v3175_v58  ;;  %3000 = vmatprep.mubr.bf16.mxu1 %v3186_v33 }
  0x91   : > { %2990 = vmatprep.subr.bf16.mxu1 %v3177_v52  ;;  %2957 = vmatmul.mubr.bf16.gmra.mrb[4].mxu0 %v2575_v38 }
  0x92   : > { %2965 = vmatpush3.bf16.msra.mxu0 %v3174_v25  ;;  %2976 = vmatprep.mubr.bf16.mxu0 %v3649_v59  ;;  %v2635_v59 = vunpack.c.l.bf16 %v2645_v54 }
  0x93   : > { %2966 = vmatprep.subr.bf16.mxu0 %v3176_v47 }
  0x94   : > { %2991 = vmatpush3.bf16.msra.mxu1 %v3177_v52  ;;  %v1981_v4 = vmul.f32 1.4285715, %v2635_v59 }
  0x95   : > { %2992 = vmatprep.subr.bf16.mxu1 %v3179_v39 }
  0x96   : > { %2967 = vmatpush3.bf16.msra.mxu0 %v3176_v47  ;;  %v1985_v47 = vmul.f32 1.4285715, %v2643_v14 }
  0x97   : > { %2968 = vmatprep.subr.bf16.mxu0 %v3178_v0 }
  0x98   : > { %2993 = vmatpush3.bf16.msra.mxu1 %v3179_v39 }
  0x99   : > { %2994 = vmatprep.subr.bf16.mxu1 %v3181_v53 }
  0x9a   : > { %2969 = vmatpush3.bf16.msra.mxu0 %v3178_v0 }
  0x9b   : > { %2970 = vmatprep.subr.bf16.mxu0 %v3180_v21 }
  0x9c   : > { %2995 = vmatpush3.bf16.msra.mxu1 %v3181_v53  ;;  %v1983_v53 = vmul.f32 1.4285715, %v2639_v16 }
  0x9d   : > { %2996 = vmatprep.subr.bf16.mxu1 %v3183_v17 }
  0x9e   : > { %2971 = vmatpush3.bf16.msra.mxu0 %v3180_v21 }
  0x9f   : > { %2972 = vmatprep.subr.bf16.mxu0 %v3182_v31 }
  0xa0   : > { %2997 = vmatpush3.bf16.msra.mxu1 %v3183_v17 }
  0xa1   : > { %2998 = vmatprep.subr.bf16.mxu1 %v3185_v50 }
  0xa2   : > { %2973 = vmatpush3.bf16.msra.mxu0 %v3182_v31  ;;  %v1986_v31 = vmul.f32 1.4285715, %v2644_v28 }
  0xa3   : > { %2974 = vmatprep.subr.bf16.mxu0 %v3184_v41 }
  0xa4   : > { %2999 = vmatpush3.bf16.msra.mxu1 %v3185_v50 }
  0xa6   : > { %2975 = vmatpush3.bf16.msra.mxu0 %v3184_v41 }
  0xa7   : > { %3001 = vmatmul.mubr.bf16.vlgmr.msra.gmra.mrb[8].mxu1 %v3187_v32 }
  0xa8   : > { %3004 = vmatprep.mubr.bf16.mxu1 %v3188_v43 }
  0xa9   : > { %2977 = vmatmul.mubr.bf16.vlgmr.msra.gmra.mrb[0].mxu0 %v3654_v34  ;;  %v2631_v34 = vunpack.c.l.bf16 %v2630_v57 }
  0xaa   : > { %2980 = vmatprep.mubr.bf16.mxu0 %v3685_v2 }
  0xab   : > { %v1979_v13 = vmul.f32 1.4285715, %v2631_v34 }
  0xaf   : > { %3005 = vmatmul.mubr.bf16.gmra.mrb[12].mxu1 %v3189_v44 }
  0xb1   : > { %2981 = vmatmul.mubr.bf16.gmra.mrb[4].mxu0 %v2601_v62 }
 0x15a   : > { %v2858_v45 = vpop.f32.mrb[0].mxu1 }
 0x15b   : > { %v1153_v49 = vpop.f32.mrb[1].mxu1 }
 0x15c   : > { %v2859_v15 = vpop.f32.mrb[2].mxu1 }
 0x15d   : > { %v1156_v19 = vpop.f32.mrb[3].mxu1 }
 0x162   : > { %v2862_v20 = vpop.f32.mrb[4].mxu1 }
 0x163   : > { %v1169_v26 = vpop.f32.mrb[5].mxu1 }
 0x164   : > { %v3804_v46 = vpop.f32.mrb[6].mxu1 }
 0x165   : > { %v3806_v51 = vpop.f32.mrb[7].mxu1 }
 0x17a   : > { %v3002_v55 = vpop.f32.mrb[8].mxu1 }
 0x17b   : > { %v2125_v40 = vpop.f32.mrb[9].mxu1 }
 0x17c   : > { %v3003_v60 = vpop.f32.mrb[10].mxu1  ;;  %v2978_v62 = vpop.f32.mrb[0].mxu0 }
 0x17d   : > { %v2128_v48 = vpop.f32.mrb[11].mxu1  ;;  %v3008_v63 = vadd.f32 %v2978_v62, %v2858_v45  ;;  %v1909_v2 = vpop.f32.mrb[1].mxu0  ;;  %v1984_v45 = vmul.f32 1.4285715, %v2640_v36 }
 0x17e   : > { %v3009_v42 = vadd.f32 %v1909_v2, %v1153_v49  ;;  %v2979_v12 = vpop.f32.mrb[2].mxu0 }
 0x17f   : > { %v1957_v30 = vadd.f32 %v3008_v63, %v3816_v24  ;;  %v3010_v37 = vadd.f32 %v2979_v12, %v2859_v15  ;;  %v1912_v5 = vpop.f32.mrb[3].mxu0 }
 0x180   : > { %v1955_v9 = vadd.f32 %v3009_v42, %v3816_v24  ;;  %v3011_v11 = vadd.f32 %v1912_v5, %v1156_v19 }
 0x181   : > { %v1958_v22 = vadd.f32 %v3010_v37, %v3816_v24  ;;  %v1989_v23 = vmul.f32 %v1981_v4, %v1957_v30 }
 0x182   : > { %v3006_v10 = vpop.f32.mrb[12].mxu1  ;;  %v1956_v58 = vadd.f32 %v3011_v11, %v3816_v24  ;;  %v1987_v1 = vmul.f32 %v1979_v13, %v1955_v9 }
 0x183   : > { %v2141_v18 = vpop.f32.mrb[13].mxu1  ;;  %v2158_v52 = vadd.f32 %v3002_v55, %v1989_v23  ;;  %v1990_v7 = vmul.f32 %v1982_v6, %v1958_v22 }
 0x184   : > { %v3007_v29 = vpop.f32.mrb[14].mxu1  ;;  %v2156_v25 = vadd.f32 %v2125_v40, %v1987_v1  ;;  %v1988_v38 = vmul.f32 %v1980_v8, %v1956_v58  ;;  %v2982_v39 = vpop.f32.mrb[4].mxu0 }
 0x185   : > { %v2144_v33 = vpop.f32.mrb[15].mxu1  ;;  %v2173_v0 = vadd.f32 %v2623_v35, %v2158_v52  ;;  %v2159_v17 = vadd.f32 %v3003_v60, %v1990_v7  ;;  %v3012_v21 = vadd.f32 %v2982_v39, %v2862_v20  ;;  %v1925_v50 = vpop.f32.mrb[5].mxu0 }
 0x186   : > { %v2171_v41 = vadd.f32 %v2623_v35, %v2156_v25  ;;  %v2157_v32 = vadd.f32 %v2128_v48, %v1988_v38  ;;  %v3013_v43 = vadd.f32 %v1925_v50, %v1169_v26  ;;  %v2983_v44 = vpop.f32.mrb[6].mxu0 }
 0x187   : > { %v2181_v49 = vmax.f32 %v2173_v0, 0.0  ;;  %v2174_v15 = vadd.f32 %v2623_v35, %v2159_v17  ;;  %v1961_v19 = vadd.f32 %v3012_v21, %v3816_v24  ;;  %v3014_v20 = vadd.f32 %v2983_v44, %v3804_v46  ;;  %v1928_v54 = vpop.f32.mrb[7].mxu0 }
 0x188   : > { %v2179_v55 = vmax.f32 %v2171_v41, 0.0  ;;  %v2172_v57 = vadd.f32 %v2623_v35, %v2157_v32  ;;  %v1959_v40 = vadd.f32 %v3013_v43, %v3816_v24  ;;  %v3015_v59 = vadd.f32 %v1928_v54, %v3806_v51 }
 0x189   : > { %2189 = vst [vmem:[%s3829_s21 + $0x10] sm:$0xff] %v2181_v49  ;;  %v2182_v26 = vmax.f32 %v2174_v15, 0.0  ;;  %v1962_v60 = vadd.f32 %v3014_v20, %v3816_v24  ;;  %v1993_v34 = vmul.f32 %v1985_v47, %v1961_v19 }
 0x18a   : > { %2187 = vst [vmem:[%s3829_s21] sm:$0xff] %v2179_v55  ;;  %v2180_v48 = vmax.f32 %v2172_v57, 0.0  ;;  %v1960_v56 = vadd.f32 %v3015_v59, %v3816_v24  ;;  %v1991_v61 = vmul.f32 %v1983_v53, %v1959_v40 }
 0x18b   : > { %2190 = vst [vmem:[%s3829_s21 + $0x18] sm:$0xff] %v2182_v26  ;;  %v2162_v46 = vadd.f32 %v3006_v10, %v1993_v34  ;;  %v1994_v62 = vmul.f32 %v1986_v31, %v1962_v60 }
 0x18c   : > { %2188 = vst [vmem:[%s3829_s21 + $0x8] sm:$0xff] %v2180_v48  ;;  %v2160_v63 = vadd.f32 %v2141_v18, %v1991_v61  ;;  %v1992_v51 = vmul.f32 %v1984_v45, %v1960_v56 }
 0x18d   : > { %v2177_v2 = vadd.f32 %v2623_v35, %v2162_v46  ;;  %v2163_v4 = vadd.f32 %v3007_v29, %v1994_v62 }
 0x18e   : > { %v2175_v27 = vadd.f32 %v2623_v35, %v2160_v63  ;;  %v2161_v3 = vadd.f32 %v2144_v33, %v1992_v51 }
 0x18f   : > { %v2185_v42 = vmax.f32 %v2177_v2, 0.0  ;;  %v2178_v12 = vadd.f32 %v2623_v35, %v2163_v4 }
 0x190   : > { %v2183_v13 = vmax.f32 %v2175_v27, 0.0  ;;  %v2176_v30 = vadd.f32 %v2623_v35, %v2161_v3 }
 0x191   : > { %2193 = vst [vmem:[%s3829_s21 + $0x30] sm:$0xff] %v2185_v42  ;;  %v2186_v24 = vmax.f32 %v2178_v12, 0.0 }
 0x192   : > { %2191 = vst [vmem:[%s3829_s21 + $0x20] sm:$0xff] %v2183_v13  ;;  %v2184_v37 = vmax.f32 %v2176_v30, 0.0 }
 0x193   : > { %2194 = vst [vmem:[%s3829_s21 + $0x38] sm:$0xff] %v2186_v24 }
 0x194   : > { %2192 = vst [vmem:[%s3829_s21 + $0x28] sm:$0xff] %v2184_v37 }
 0x195 PF: > { %s17_s26 = sadd.s32 1, %s3212_s26   ;;  %s3866_s24 = smov %s3208_s25 }
 0x196   : > { %p14_p5 = scmp.ge.s32.totalorder %s17_s26, 4   ;;  %s3867_s25 = smov %s3869_s27 }
 0x198   :  { %16 = sbr.rel (!%p14_p5) target bundleno = 2 (0x2), region = 104 }

</bundles_post_ra>
